<compile_context>
chip_gen: v7x
topology: tpu7x:2x2x1
jax: 0.10.0
libtpu: 0.0.40
codegen_flags: <defaults>
</compile_context>

<pallas_src>
import functools

import jax
import jax.numpy as jnp
from jax import lax
from jax.experimental import pallas as pl
from jax.experimental.pallas import tpu as pltpu

BN_EPS = 1e-5
LANE = 128


def _round_up(x, m):
    return (x + m - 1) // m * m


def _pad2(a, rows, cols):
    out = jnp.zeros((rows, cols), jnp.float32)
    return out.at[: a.shape[0], : a.shape[1]].set(a.astype(jnp.float32))


def _pad_row(v, cols):
    out = jnp.zeros((1, cols), jnp.float32)
    return out.at[0, : v.shape[0]].set(v.astype(jnp.float32))


# --------------------------------------------------------------------------
# Kernel 1: one GIN layer = sum-aggregation (tiled A @ X reduction) + MLP
#           epilogue + partial BatchNorm statistics.
# --------------------------------------------------------------------------
def _gin_layer_kernel(a_ref, xk_ref, xs_ref, scale_ref, shift_ref,
                      w1_ref, b1_ref, w2_ref, b2_ref,
                      h_ref, stats_ref, acc_ref,
                      *, apply_input_act, eps, n_valid, tm):
    # All grid queries hoisted to the kernel top level (NOT inside pl.when
    # bodies) so the interpret/CPU fallback can rewrite them correctly.
    i = pl.program_id(0)
    k = pl.program_id(1)
    nk = pl.num_programs(1)
    row = i * tm + lax.broadcasted_iota(jnp.int32, (tm, 1), 0)
    row_valid = row < n_valid

    def transform(t):
        # Fused BatchNorm-affine + ReLU of the *previous* layer's output.
        # (scale/shift are pre-folded in the wrapper from global statistics.)
        if apply_input_act:
            t = jnp.maximum(scale_ref[...] * t + shift_ref[...], 0.0)
        return t

    @pl.when(k == 0)
    def _init():
        # GIN self term: (1 + eps) * x_i
        acc_ref[...] = (1.0 + eps) * transform(xs_ref[...])

    # Sum aggregation over neighbours: acc += A[row-tile, k-tile] @ x[k-tile]
    acc_ref[...] += jnp.dot(a_ref[...], transform(xk_ref[...]),
                            preferred_element_type=jnp.float32)

    @pl.when(k == nk - 1)
    def _finalize():
        z = acc_ref[...]
        # GINConv MLP: Linear -> ReLU -> Linear
        # TODO(synk): trailing Dropout inside nn1/nn2 is identity (eval mode).
        h = jnp.maximum(
            jnp.dot(z, w1_ref[...], preferred_element_type=jnp.float32)
            + b1_ref[...], 0.0)
        h = jnp.dot(h, w2_ref[...],
                    preferred_element_type=jnp.float32) + b2_ref[...]
        # Zero padded rows so they do not pollute the global BN statistics.
        h = jnp.where(row_valid, h, 0.0)
        h_ref[...] = h
        # Per-row-tile partial per-feature sum / sum-of-squares for BatchNorm.
        stats_ref[...] = jnp.concatenate(
            [jnp.sum(h, axis=0, keepdims=True),
             jnp.sum(h * h, axis=0, keepdims=True)], axis=0)[None, :, :]


def _gin_layer(a_pad, x_pad, scale, shift, w1, b1, w2, b2, *,
               apply_input_act, eps, n_valid, tm, tk):
    n_pad = a_pad.shape[0]
    f_pad = x_pad.shape[1]
    h_pad = w1.shape[1]
    rtiles = n_pad // tm
    ktiles = n_pad // tk

    kernel = functools.partial(
        _gin_layer_kernel, apply_input_act=apply_input_act, eps=eps,
        n_valid=n_valid, tm=tm)

    flops = (2 * n_pad * n_pad * f_pad
             + 2 * n_pad * (f_pad * h_pad + h_pad * h_pad))
    bytes_accessed = 4 * (n_pad * n_pad + 2 * n_pad * f_pad + n_pad * h_pad
                          + f_pad * h_pad + h_pad * h_pad + 6 * h_pad)

    h_out, stats = pl.pallas_call(
        kernel,
        out_shape=(
            jax.ShapeDtypeStruct((n_pad, h_pad), jnp.float32),
            jax.ShapeDtypeStruct((rtiles, 2, h_pad), jnp.float32),
        ),
        grid_spec=pltpu.PrefetchScalarGridSpec(
            num_scalar_prefetch=0,
            grid=(rtiles, ktiles),
            in_specs=[
                pl.BlockSpec((tm, tk), lambda i, k: (i, k)),        # A tile
                pl.BlockSpec((tk, f_pad), lambda i, k: (k, 0)),     # X K-tile
                pl.BlockSpec((tm, f_pad), lambda i, k: (i, 0)),     # X self-tile
                pl.BlockSpec((1, f_pad), lambda i, k: (0, 0)),      # bn scale
                pl.BlockSpec((1, f_pad), lambda i, k: (0, 0)),      # bn shift
                pl.BlockSpec((f_pad, h_pad), lambda i, k: (0, 0)),  # W1
                pl.BlockSpec((1, h_pad), lambda i, k: (0, 0)),      # b1
                pl.BlockSpec((h_pad, h_pad), lambda i, k: (0, 0)),  # W2
                pl.BlockSpec((1, h_pad), lambda i, k: (0, 0)),      # b2
            ],
            out_specs=[
                pl.BlockSpec((tm, h_pad), lambda i, k: (i, 0)),
                pl.BlockSpec((1, 2, h_pad), lambda i, k: (i, 0, 0)),
            ],
            scratch_shapes=[pltpu.VMEM((tm, f_pad), jnp.float32)],
        ),
        compiler_params=pltpu.CompilerParams(
            dimension_semantics=("parallel", "arbitrary"),
            vmem_limit_bytes=32 * 1024 * 1024,
        ),
        cost_estimate=pl.CostEstimate(
            flops=flops, transcendentals=0, bytes_accessed=bytes_accessed),
    )(a_pad, x_pad, x_pad, scale, shift, w1, b1, w2, b2)
    return h_out, stats


# --------------------------------------------------------------------------
# Kernel 2: final bn2-affine + fc2, row-tiled, lane-dense padded output.
# --------------------------------------------------------------------------
def _bn_fc2_kernel(h_ref, scale_ref, shift_ref, w_ref, b_ref, out_ref):
    y = scale_ref[...] * h_ref[...] + shift_ref[...]   # bn2 (no ReLU after)
    # TODO(synk): self.dropout before fc2 is identity (eval-mode determinism).
    out_ref[...] = jnp.dot(y, w_ref[...],
                           preferred_element_type=jnp.float32) + b_ref[...]


def _bn_fc2(h_pad, scale, shift, w, b, *, tm):
    n_pad, h_dim = h_pad.shape
    o_pad = w.shape[1]
    rtiles = n_pad // tm
    return pl.pallas_call(
        _bn_fc2_kernel,
        out_shape=jax.ShapeDtypeStruct((n_pad, o_pad), jnp.float32),
        grid_spec=pltpu.PrefetchScalarGridSpec(
            num_scalar_prefetch=0,
            grid=(rtiles,),
            in_specs=[
                pl.BlockSpec((tm, h_dim), lambda i: (i, 0)),
                pl.BlockSpec((1, h_dim), lambda i: (0, 0)),
                pl.BlockSpec((1, h_dim), lambda i: (0, 0)),
                pl.BlockSpec((h_dim, o_pad), lambda i: (0, 0)),
                pl.BlockSpec((1, o_pad), lambda i: (0, 0)),
            ],
            out_specs=pl.BlockSpec((tm, o_pad), lambda i: (i, 0)),
        ),
        compiler_params=pltpu.CompilerParams(
            dimension_semantics=("parallel",),
            vmem_limit_bytes=32 * 1024 * 1024,
        ),
    )(h_pad, scale, shift, w, b)


# --------------------------------------------------------------------------
# Wrapper glue
# --------------------------------------------------------------------------
def _fold_bn(stats, gamma_row, beta_row, n):
    # Combine per-tile partial sums -> training-mode BatchNorm1d affine.
    s = jnp.sum(stats[:, 0, :], axis=0, keepdims=True)
    ss = jnp.sum(stats[:, 1, :], axis=0, keepdims=True)
    mean = s / n
    var = jnp.maximum(ss / n - mean * mean, 0.0)      # biased variance
    scale = gamma_row * lax.rsqrt(var + BN_EPS)
    shift = beta_row - mean * scale
    return scale, shift


def build_gin_adjacency(edge_index, n_pad):
    # Dense unnormalized adjacency matching GINConv sum aggregation:
    # A[dst, src] += 1 per edge (no self loops, no degree normalization).
    # TODO(synk): for large sparse graphs replace the dense A @ X contraction
    # with a CSR neighbour-gather (PrefetchScalarGridSpec + manual DMA).
    src, dst = edge_index[0], edge_index[1]
    return jnp.zeros((n_pad, n_pad), jnp.float32).at[dst, src].add(1.0)


def gin_forward(x, edge_index, params, *, eps=0.0, block=128):
    # block: row/reduction tile size. Must be a multiple of 128. 256-512 is a
    # better choice for large N on v5e/v6e; keep <=256 on v7x (64 MiB VMEM).
    n, f = x.shape
    dim = params["w11"].shape[1]
    out_dim = params["wfc2"].shape[1]

    assert block % LANE == 0
    f_pad = _round_up(max(f, 1), LANE)
    h_pad = _round_up(dim, LANE)
    o_pad = _round_up(out_dim, LANE)
    n_pad = _round_up(n, block)
    tm = tk = block

    a_pad = build_gin_adjacency(edge_index, n_pad)
    x_pad = _pad2(x, n_pad, f_pad)

    w11 = _pad2(params["w11"], f_pad, h_pad); b11 = _pad_row(params["b11"], h_pad)
    w12 = _pad2(params["w12"], h_pad, h_pad); b12 = _pad_row(params["b12"], h_pad)
    g1 = _pad_row(params["g1"], h_pad);       be1 = _pad_row(params["be1"], h_pad)
    w21 = _pad2(params["w21"], h_pad, h_pad); b21 = _pad_row(params["b21"], h_pad)
    w22 = _pad2(params["w22"], h_pad, h_pad); b22 = _pad_row(params["b22"], h_pad)
    g2 = _pad_row(params["g2"], h_pad);       be2 = _pad_row(params["be2"], h_pad)
    wfc2 = _pad2(params["wfc2"], h_pad, o_pad); bfc2 = _pad_row(params["bfc2"], o_pad)

    ones_f = jnp.ones((1, f_pad), jnp.float32)
    zeros_f = jnp.zeros((1, f_pad), jnp.float32)

    # GINConv 1 (+ partial bn1 statistics)
    h1, stats1 = _gin_layer(a_pad, x_pad, ones_f, zeros_f, w11, b11, w12, b12,
                            apply_input_act=False, eps=eps, n_valid=n,
                            tm=tm, tk=tk)
    # relu(bn1(.)) is folded into layer 2's input transform.
    scale1, shift1 = _fold_bn(stats1, g1, be1, n)

    # GINConv 2 over y1 = relu(bn1(h1)) (+ partial bn2 statistics)
    h2, stats2 = _gin_layer(a_pad, h1, scale1, shift1, w21, b21, w22, b22,
                            apply_input_act=True, eps=eps, n_valid=n,
                            tm=tm, tk=tk)
    scale2, shift2 = _fold_bn(stats2, g2, be2, n)

    # bn2 + dropout(identity) + fc2 ; lane-dense [N_pad, 128] output slab.
    # NOTE: self.fc1 of the PyTorch module is never used in forward -> omitted.
    out_pad = _bn_fc2(h2, scale2, shift2, wfc2, bfc2, tm=tm)
    return out_pad[:n, :out_dim]


def init_params(key, num_features, dim, output_dim):
    ks = jax.random.split(key, 10)

    def lin(kw, kb, fi, fo):
        bound = 1.0 / jnp.sqrt(fi)
        w = jax.random.uniform(kw, (fi, fo), jnp.float32, -bound, bound)
        b = jax.random.uniform(kb, (fo,), jnp.float32, -bound, bound)
        return w, b

    w11, b11 = lin(ks[0], ks[1], num_features, dim)
    w12, b12 = lin(ks[2], ks[3], dim, dim)
    w21, b21 = lin(ks[4], ks[5], dim, dim)
    w22, b22 = lin(ks[6], ks[7], dim, dim)
    wfc2, bfc2 = lin(ks[8], ks[9], dim, output_dim)
    return {
        "w11": w11, "b11": b11, "w12": w12, "b12": b12,
        "g1": jnp.ones((dim,), jnp.float32), "be1": jnp.zeros((dim,), jnp.float32),
        "w21": w21, "b21": b21, "w22": w22, "b22": b22,
        "g2": jnp.ones((dim,), jnp.float32), "be2": jnp.zeros((dim,), jnp.float32),
        "wfc2": wfc2, "bfc2": bfc2,
    }


def gin_reference(x, edge_index, params, eps=0.0):
    """Pure-JAX reference of the same forward (for validation)."""
    n = x.shape[0]
    a = jnp.zeros((n, n), jnp.float32).at[edge_index[1], edge_index[0]].add(1.0)

    def bn(h, g, b):
        mean = jnp.mean(h, axis=0, keepdims=True)
        var = jnp.mean((h - mean) ** 2, axis=0, keepdims=True)
        return g * (h - mean) * lax.rsqrt(var + BN_EPS) + b

    def mlp(h, w1, b1, w2, b2):
        return jnp.maximum(h @ w1 + b1, 0.0) @ w2 + b2

    h = mlp((1.0 + eps) * x + a @ x,
            params["w11"], params["b11"], params["w12"], params["b12"])
    h = jnp.maximum(bn(h, params["g1"], params["be1"]), 0.0)
    h = mlp((1.0 + eps) * h + a @ h,
            params["w21"], params["b21"], params["w22"], params["b22"])
    h = bn(h, params["g2"], params["be2"])
    return h @ params["wfc2"] + params["bfc2"]


if __name__ == "__main__":
    key = jax.random.PRNGKey(0)
    k_x, k_p = jax.random.split(key, 2)

    N, F_IN, DIM, OUT_DIM = 200, 4, 32, 1   # N=200 -> padded 256 -> 2x2 grid

    x = jax.random.normal(k_x, (N, F_IN), jnp.float32)

    # Deterministic graph: bidirectional ring + bidirectional +7 chords.
    src = jnp.arange(N, dtype=jnp.int32)
    nxt = (src + 1) % N
    chord = (src + 7) % N
    edge_index = jnp.stack([
        jnp.concatenate([src, nxt, src, chord]),
        jnp.concatenate([nxt, src, chord, src]),
    ])  # [2, 4N]

    params = init_params(k_p, F_IN, DIM, OUT_DIM)

    y = gin_forward(x, edge_index, params, block=128)
    jax.block_until_ready(y)
    assert y.shape == (N, OUT_DIM)

    y_ref = gin_reference(x, edge_index, params)
    max_err = float(jnp.max(jnp.abs(y - y_ref)))
    assert max_err < 5e-3, f"mismatch vs reference: {max_err}"
    print("KERNEL_OK")
</pallas_src>

<mosaic_0001>
module attributes {stable_mosaic.version = 11 : i64} {
  func.func @_gin_layer_kernel(%arg0: i32, %arg1: i32, %arg2: memref<128x128xf32, #tpu.memory_space<vmem>>, %arg3: memref<128x128xf32, #tpu.memory_space<vmem>>, %arg4: memref<128x128xf32, #tpu.memory_space<vmem>>, %arg5: memref<1x128xf32, #tpu.memory_space<vmem>>, %arg6: memref<1x128xf32, #tpu.memory_space<vmem>>, %arg7: memref<128x128xf32, #tpu.memory_space<vmem>>, %arg8: memref<1x128xf32, #tpu.memory_space<vmem>>, %arg9: memref<128x128xf32, #tpu.memory_space<vmem>>, %arg10: memref<1x128xf32, #tpu.memory_space<vmem>>, %arg11: memref<128x128xf32, #tpu.memory_space<vmem>>, %arg12: memref<1x2x128xf32, #tpu.memory_space<vmem>>, %arg13: memref<128x128xf32, #tpu.memory_space<vmem>>) attributes {dimension_semantics = [#tpu.dimension_semantics<parallel>, #tpu.dimension_semantics<arbitrary>], iteration_bounds = array<i64: 2, 2>, scalar_prefetch = 0 : i64, scratch_operands = 1 : i64, tpu.core_type = #tpu.core_type<tc>, window_params = [{transform_indices = @transform_0, window_bounds = array<i64: 128, 128>}, {transform_indices = @transform_1, window_bounds = array<i64: 128, 128>}, {transform_indices = @transform_2, window_bounds = array<i64: 128, 128>}, {pipeline_mode = #tpu.pipeline_mode<synchronous>, transform_indices = @transform_3, window_bounds = array<i64: 1, 128>}, {pipeline_mode = #tpu.pipeline_mode<synchronous>, transform_indices = @transform_4, window_bounds = array<i64: 1, 128>}, {pipeline_mode = #tpu.pipeline_mode<synchronous>, transform_indices = @transform_5, window_bounds = array<i64: 128, 128>}, {pipeline_mode = #tpu.pipeline_mode<synchronous>, transform_indices = @transform_6, window_bounds = array<i64: 1, 128>}, {pipeline_mode = #tpu.pipeline_mode<synchronous>, transform_indices = @transform_7, window_bounds = array<i64: 128, 128>}, {pipeline_mode = #tpu.pipeline_mode<synchronous>, transform_indices = @transform_8, window_bounds = array<i64: 1, 128>}, {transform_indices = @transform_9, window_bounds = array<i64: 128, 128>}, {transform_indices = @transform_10, window_bounds = array<i64: 1, 2, 128>}]} {
    %c128_i32 = arith.constant 128 : i32
    %0 = arith.muli %arg0, %c128_i32 : i32
    %1 = tpu.iota {dimensions = array<i32: 0>} : vector<128x1xi32>
    %2 = vector.broadcast %0 : i32 to vector<128x1xi32>
    %3 = arith.addi %2, %1 : vector<128x1xi32>
    %c200_i32 = arith.constant 200 : i32
    %4 = vector.broadcast %c200_i32 : i32 to vector<128x1xi32>
    %5 = arith.cmpi slt, %3, %4 : vector<128x1xi32>
    %c0_i32 = arith.constant 0 : i32
    %6 = arith.cmpi eq, %arg1, %c0_i32 : i32
    %7 = arith.extui %6 : i1 to i32
    %c0_i32_0 = arith.constant 0 : i32
    %8 = arith.cmpi ne, %7, %c0_i32_0 : i32
    scf.if %8 {
      %c0_9 = arith.constant 0 : index
      %c0_10 = arith.constant 0 : index
      %18 = vector.load %arg4[%c0_9, %c0_10] : memref<128x128xf32, #tpu.memory_space<vmem>>, vector<128x128xf32>
      %cst_11 = arith.constant 1.000000e+00 : f32
      %19 = vector.broadcast %cst_11 : f32 to vector<128x128xf32>
      %20 = arith.mulf %19, %18 : vector<128x128xf32>
      %c0_12 = arith.constant 0 : index
      %c0_13 = arith.constant 0 : index
      %21 = vector.load %arg13[%c0_12, %c0_13] : memref<128x128xf32, #tpu.memory_space<vmem>>, vector<128x128xf32>
      tpu.vector_store %arg13[%c0_12, %c0_13], %20 {strides = array<i32>} : memref<128x128xf32, #tpu.memory_space<vmem>>, vector<128x128xf32>,
    } else {
    }
    %c0 = arith.constant 0 : index
    %c0_1 = arith.constant 0 : index
    %9 = vector.load %arg13[%c0, %c0_1] : memref<128x128xf32, #tpu.memory_space<vmem>>, vector<128x128xf32>
    %c0_2 = arith.constant 0 : index
    %c0_3 = arith.constant 0 : index
    %10 = vector.load %arg2[%c0_2, %c0_3] : memref<128x128xf32, #tpu.memory_space<vmem>>, vector<128x128xf32>
    %c0_4 = arith.constant 0 : index
    %c0_5 = arith.constant 0 : index
    %11 = vector.load %arg3[%c0_4, %c0_5] : memref<128x128xf32, #tpu.memory_space<vmem>>, vector<128x128xf32>
    %cst = arith.constant dense<0.000000e+00> : vector<128x128xf32>
    %12 = tpu.matmul %10, %11, %cst {dimension_numbers = #tpu.dot_dimension_numbers<[1], [0], [0], [1], [0, 0, 1, 1], [], []>} : vector<128x128xf32>, vector<128x128xf32>, vector<128x128xf32> -> vector<128x128xf32>
    %13 = arith.addf %9, %12 : vector<128x128xf32>
    %c0_6 = arith.constant 0 : index
    %c0_7 = arith.constant 0 : index
    %14 = vector.load %arg13[%c0_6, %c0_7] : memref<128x128xf32, #tpu.memory_space<vmem>>, vector<128x128xf32>
    tpu.vector_store %arg13[%c0_6, %c0_7], %13 {strides = array<i32>} : memref<128x128xf32, #tpu.memory_space<vmem>>, vector<128x128xf32>,
    %c1_i32 = arith.constant 1 : i32
    %15 = arith.cmpi eq, %arg1, %c1_i32 : i32
    %16 = arith.extui %15 : i1 to i32
    %c0_i32_8 = arith.constant 0 : i32
    %17 = arith.cmpi ne, %16, %c0_i32_8 : i32
    scf.if %17 {
      %c0_9 = arith.constant 0 : index
      %c0_10 = arith.constant 0 : index
      %18 = vector.load %arg13[%c0_9, %c0_10] : memref<128x128xf32, #tpu.memory_space<vmem>>, vector<128x128xf32>
      %c0_11 = arith.constant 0 : index
      %c0_12 = arith.constant 0 : index
      %19 = vector.load %arg7[%c0_11, %c0_12] : memref<128x128xf32, #tpu.memory_space<vmem>>, vector<128x128xf32>
      %cst_13 = arith.constant dense<0.000000e+00> : vector<128x128xf32>
      %20 = tpu.matmul %18, %19, %cst_13 {dimension_numbers = #tpu.dot_dimension_numbers<[1], [0], [0], [1], [0, 0, 1, 1], [], []>} : vector<128x128xf32>, vector<128x128xf32>, vector<128x128xf32> -> vector<128x128xf32>
      %c0_14 = arith.constant 0 : index
      %c0_15 = arith.constant 0 : index
      %21 = vector.load %arg8[%c0_14, %c0_15] : memref<1x128xf32, #tpu.memory_space<vmem>>, vector<1x128xf32>
      %22 = vector.broadcast %21 : vector<1x128xf32> to vector<128x128xf32>
      %23 = arith.addf %20, %22 : vector<128x128xf32>
      %cst_16 = arith.constant 0.000000e+00 : f32
      %24 = vector.broadcast %cst_16 : f32 to vector<128x128xf32>
      %25 = arith.maximumf %23, %24 : vector<128x128xf32>
      %c0_17 = arith.constant 0 : index
      %c0_18 = arith.constant 0 : index
      %26 = vector.load %arg9[%c0_17, %c0_18] : memref<128x128xf32, #tpu.memory_space<vmem>>, vector<128x128xf32>
      %cst_19 = arith.constant dense<0.000000e+00> : vector<128x128xf32>
      %27 = tpu.matmul %25, %26, %cst_19 {dimension_numbers = #tpu.dot_dimension_numbers<[1], [0], [0], [1], [0, 0, 1, 1], [], []>} : vector<128x128xf32>, vector<128x128xf32>, vector<128x128xf32> -> vector<128x128xf32>
      %c0_20 = arith.constant 0 : index
      %c0_21 = arith.constant 0 : index
      %28 = vector.load %arg10[%c0_20, %c0_21] : memref<1x128xf32, #tpu.memory_space<vmem>>, vector<1x128xf32>
      %29 = vector.broadcast %28 : vector<1x128xf32> to vector<128x128xf32>
      %30 = arith.addf %27, %29 : vector<128x128xf32>
      %cst_22 = arith.constant 0.000000e+00 : f32
      %31 = vector.shape_cast %5 : vector<128x1xi1> to vector<128x1xi1>
      %32 = vector.broadcast %31 : vector<128x1xi1> to vector<128x128xi1>
      %33 = vector.broadcast %cst_22 : f32 to vector<128x128xf32>
      %34 = arith.select %32, %30, %33 : vector<128x128xi1>, vector<128x128xf32>
      %c0_23 = arith.constant 0 : index
      %c0_24 = arith.constant 0 : index
      %35 = vector.load %arg11[%c0_23, %c0_24] : memref<128x128xf32, #tpu.memory_space<vmem>>, vector<128x128xf32>
      tpu.vector_store %arg11[%c0_23, %c0_24], %34 {strides = array<i32>} : memref<128x128xf32, #tpu.memory_space<vmem>>, vector<128x128xf32>,
      %cst_25 = arith.constant dense<0.000000e+00> : vector<128xf32>
      %36 = vector.multi_reduction <add>, %34, %cst_25 [0] : vector<128x128xf32> to vector<128xf32>
      %37 = vector.shape_cast %36 : vector<128xf32> to vector<1x128xf32>
      %38 = arith.mulf %34, %34 : vector<128x128xf32>
      %cst_26 = arith.constant dense<0.000000e+00> : vector<128xf32>
      %39 = vector.multi_reduction <add>, %38, %cst_26 [0] : vector<128x128xf32> to vector<128xf32>
      %40 = vector.shape_cast %39 : vector<128xf32> to vector<1x128xf32>
      %41 = tpu.concatenate %37, %40 in 0 : vector<1x128xf32>, vector<1x128xf32> -> vector<2x128xf32>
      %42 = vector.shape_cast %41 : vector<2x128xf32> to vector<1x2x128xf32>
      %c0_27 = arith.constant 0 : index
      %c0_28 = arith.constant 0 : index
      %c0_29 = arith.constant 0 : index
      %43 = vector.load %arg12[%c0_27, %c0_28, %c0_29] : memref<1x2x128xf32, #tpu.memory_space<vmem>>, vector<1x2x128xf32>
      tpu.vector_store %arg12[%c0_27, %c0_28, %c0_29], %42 {strides = array<i32>} : memref<1x2x128xf32, #tpu.memory_space<vmem>>, vector<1x2x128xf32>,
    } else {
    }
    return
  }
  func.func @transform_0(%arg0: i32, %arg1: i32) -> (i32, i32) {
    %c0_i32 = arith.constant 0 : i32
    return %arg0, %arg1 : i32, i32
  }
  func.func @transform_1(%arg0: i32, %arg1: i32) -> (i32, i32) {
    %c0_i32 = arith.constant 0 : i32
    %c0_i32_0 = arith.constant 0 : i32
    return %arg1, %c0_i32 : i32, i32
  }
  func.func @transform_2(%arg0: i32, %arg1: i32) -> (i32, i32) {
    %c0_i32 = arith.constant 0 : i32
    %c0_i32_0 = arith.constant 0 : i32
    return %arg0, %c0_i32 : i32, i32
  }
  func.func @transform_3(%arg0: i32, %arg1: i32) -> (i32, i32) {
    %c0_i32 = arith.constant 0 : i32
    %c0_i32_0 = arith.constant 0 : i32
    %c0_i32_1 = arith.constant 0 : i32
    return %c0_i32, %c0_i32_0 : i32, i32
  }
  func.func @transform_4(%arg0: i32, %arg1: i32) -> (i32, i32) {
    %c0_i32 = arith.constant 0 : i32
    %c0_i32_0 = arith.constant 0 : i32
    %c0_i32_1 = arith.constant 0 : i32
    return %c0_i32, %c0_i32_0 : i32, i32
  }
  func.func @transform_5(%arg0: i32, %arg1: i32) -> (i32, i32) {
    %c0_i32 = arith.constant 0 : i32
    %c0_i32_0 = arith.constant 0 : i32
    %c0_i32_1 = arith.constant 0 : i32
    return %c0_i32, %c0_i32_0 : i32, i32
  }
  func.func @transform_6(%arg0: i32, %arg1: i32) -> (i32, i32) {
    %c0_i32 = arith.constant 0 : i32
    %c0_i32_0 = arith.constant 0 : i32
    %c0_i32_1 = arith.constant 0 : i32
    return %c0_i32, %c0_i32_0 : i32, i32
  }
  func.func @transform_7(%arg0: i32, %arg1: i32) -> (i32, i32) {
    %c0_i32 = arith.constant 0 : i32
    %c0_i32_0 = arith.constant 0 : i32
    %c0_i32_1 = arith.constant 0 : i32
    return %c0_i32, %c0_i32_0 : i32, i32
  }
  func.func @transform_8(%arg0: i32, %arg1: i32) -> (i32, i32) {
    %c0_i32 = arith.constant 0 : i32
    %c0_i32_0 = arith.constant 0 : i32
    %c0_i32_1 = arith.constant 0 : i32
    return %c0_i32, %c0_i32_0 : i32, i32
  }
  func.func @transform_9(%arg0: i32, %arg1: i32) -> (i32, i32) {
    %c0_i32 = arith.constant 0 : i32
    %c0_i32_0 = arith.constant 0 : i32
    return %arg0, %c0_i32 : i32, i32
  }
  func.func @transform_10(%arg0: i32, %arg1: i32) -> (i32, i32, i32) {
    %c0_i32 = arith.constant 0 : i32
    %c0_i32_0 = arith.constant 0 : i32
    %c0_i32_1 = arith.constant 0 : i32
    return %arg0, %c0_i32, %c0_i32_0 : i32, i32, i32
  }
}

</mosaic_0001>

<bundles_post_ra>
// kernel: tpu_custom_call.1
= control target key start
LH: loop header
LB: loop body
LE: loop exit
PB: predicated region body
PF: predicated region fallthrough
CT: control target
= control target key end

     0   :  { %s3221_s0 = inlined_call_operand.hbm [shape: f32[256,256], index: 0, kind: input, shape index: {}]   ;;  %s3222_s1 = inlined_call_operand.hbm [shape: f32[256,128], index: 1, kind: input, shape index: {}]   ;;  %s3223_s2 = inlined_call_operand.hbm [shape: f32[256,128], index: 2, kind: input, shape index: {}]   ;;  %s3224_s3 = inlined_call_operand.vmem [shape: f32[1,128], index: 3, kind: input, shape index: {}]   ;;  %s3225_s4 = inlined_call_operand.vmem [shape: f32[1,128], index: 4, kind: input, shape index: {}]   ;;  %s3226_s5 = inlined_call_operand.hbm [shape: f32[128,128], index: 5, kind: input, shape index: {}]   ;;  %s3227_s6 = inlined_call_operand.vmem [shape: f32[1,128], index: 6, kind: input, shape index: {}]   ;;  %s3228_s7 = inlined_call_operand.hbm [shape: f32[128,128], index: 7, kind: input, shape index: {}]   ;;  %s3229_s8 = inlined_call_operand.vmem [shape: f32[1,128], index: 8, kind: input, shape index: {}]   ;;  %s3230_s9 = inlined_call_operand.hbm [shape: f32[256,128], index: 9, kind: output, shape index: {0}]   ;;  %s3231_s10 = inlined_call_operand.hbm [shape: f32[2,2,128], index: 10, kind: output, shape index: {1}]  }
   0x1   :  { %3254 = sst [smem:[#allocation29_spill]] %s3221_s0 }
   0x2   :  { %3255 = sst [smem:[#allocation30_spill]] %s3222_s1 }
   0x3   :  { %3256 = sst [smem:[#allocation31_spill]] %s3223_s2 }
   0x4   :  { %3257 = sst [smem:[#allocation32_spill]] %s3226_s5 }
   0x5   :  { %3258 = sst [smem:[#allocation33_spill]] %s3227_s6 }
   0x6   :  { %3259 = sst [smem:[#allocation34_spill]] %s3228_s7 }
   0x7   :  { %3260 = sst [smem:[#allocation35_spill]] %s3229_s8 }
   0x8   :  { %3261 = sst [smem:[#allocation36_spill]] %s3230_s9 }
   0x9   :  { %3262 = sst [smem:[#allocation37_spill]] %s3231_s10 }
   0xa   :  { %16 = vsyncpa [#allocation4], 0 }
   0xb   :  { %18 = vsyncpa [#allocation4 + $0x1], 0 }
   0xc   :  { %19 = vsyncpa [#allocation7], 0 }
   0xd   :  { %21 = vsyncpa [#allocation7 + $0x1], 0 }
   0xe   :  { %22 = vsyncpa [#allocation10], 0 }
   0xf   :  { %23 = vsyncpa [#allocation5], 0 }
  0x10   :  { %25 = vsyncpa [#allocation5 + $0x1], 0 }
  0x11   :  { %26 = vsyncpa [#allocation14], 0 }
  0x12   :  { %28 = vsyncpa [#allocation14 + $0x1], 0  ;;  %s2524_s4 = smov 0   ;;  %s2526_s12 = smov 0  }
  0x13   :  { %s2528_s13 = smov 0   ;;  %s2530_s14 = smov 0  }
  0x14   :  { %s2532_s15 = smov 0   ;;  %s2534_s16 = smov 0  }
  0x15   :  { %s2536_s17 = smov 0   ;;  %s2538_s18 = smov 0  }
  0x16   :  { %s2540_s19 = smov 0   ;;  %s2542_s20 = smov 0  }
  0x17   :  { %s2544_s21 = smov 0   ;;  %s2546_s22 = smov 0  }
  0x18   :  { %s2548_s23 = smov 0   ;;  %s2550_s24 = smov 0  }
  0x19 LB: > { %3263 = sst [smem:[#allocation21_spill]] %s2419_s15  ;;  %s2595_s25 = sadd.s32 4294967295, %s2455_s24   ;;  %s2455_s24 = sphi %s2550_s24, %s34_s24   ;;  %s2451_s23 = sphi %s2548_s23, %s3338_s23   ;;  %s2447_s22 = sphi %s2546_s22, %s3337_s22   ;;  %s2443_s21 = sphi %s2544_s21, %s3336_s21   ;;  %s2439_s20 = sphi %s2542_s20, %s3335_s20   ;;  %s2435_s19 = sphi %s2540_s19, %s3334_s19   ;;  %s2431_s18 = sphi %s2538_s18, %s3333_s18   ;;  %s2427_s17 = sphi %s2536_s17, %s3332_s17   ;;  %s2423_s16 = sphi %s2534_s16, %s3331_s16   ;;  %s2419_s15 = sphi %s2532_s15, %s3322_s15   ;;  %s2415_s14 = sphi %s2530_s14, %s3330_s14   ;;  %s2411_s13 = sphi %s2528_s13, %s3329_s13   ;;  %s2407_s12 = sphi %s2526_s12, %s3328_s12   ;;  %s2403_s4 = sphi %s2524_s4, %s3327_s4  }
  0x1a   : > { %3264 = sst [smem:[#allocation22_spill]] %s2423_s16  ;;  %p1538_p0 = scmp.ge.s32.totalorder %s2455_s24, 1 }
  0x1b   : > { %3265 = sst [smem:[#allocation23_spill]] %s2439_s20  ;;  %p3234_p1 = scmp.eq.s32.totalorder %s2595_s25, 0 }
  0x1c   : > { %3266 = sst [smem:[#allocation24_spill]] %s2443_s21  ;;  %p309_p3 = scmp.lt.s32.totalorder %s2455_s24, 5 }
  0x1d   : > { %s2457_s27 = smov [#allocation9]   ;;  %s3269_s5 = sld [smem:[#allocation32_spill]] }
  0x1e   : > { %p2601_p4 = pnand %p1538_p0, %p309_p3  ;;  %s327_s28 = sshll.u32 %s2457_s27, 4  ;;  %s328_s28 = int_to_ptr.vmem [resolvable:$true] %s327_s28 }
  0x20   : > { %s3267_s26 = scalar_select %p2601_p4, 1, 0 }
  0x21   : > { %p1970_p5 = pneg %p2601_p4 }
  0x23   : > { %p2609_p6 = pnand %p1970_p5, %p3234_p1  ;;  %s2119_s3 = scalar_lea.hbm %s3269_s5, 2048 }
  0x24   : > { %p2120_p7 = scmp.ne.s32.totalorder %s3269_s5, %s2119_s3  ;;  %p2126_p11 = scmp.lt.u32.totalorder %s2119_s3, %s3269_s5 }
  0x25   : > { %p3249_p8 = pneg %p2609_p6 }
  0x27   : > { %p2122_p9 = pnand %p3249_p8, %p2120_p7 }
  0x29   : > { %p2123_p10 = pneg %p2122_p9 }
  0x2b   : > { %p2128_p12 = pnand %p2126_p11, %p2123_p10 }
  0x2d   : > { %2131 = shalt.err (!%p2128_p12)
}
  0x2e   : > { %s2132_s30 = scalar_lea.vmem %s328_s28, 2048  ;;  %p2140_p5 = scmp.lt.s32.totalorder %s328_s28, %s328_s28 }
  0x2f   : > { %p2133_p13 = scmp.ne.s32.totalorder %s328_s28, %s2132_s30  ;;  %p2141_p2 = scmp.lt.s32.totalorder %s2132_s30, %s2132_s30 }
  0x31   : > { %p2135_p0 = pnand %p2133_p13, %p3249_p8  ;;  %p2142_p1 = por %p2141_p2, %p2140_p5 }
  0x33   : > { %p2136_p3 = pneg %p2135_p0 }
  0x35   : > { %p2143_p4 = pnand %p2142_p1, %p2136_p3 }
  0x37   : > { %2146 = shalt.err (!%p2143_p4)
}
  0x38   : > { %s3236_s9 = smov 128   ;;  %s3238_s8 = smov 8  }
  0x39   : > { %1973 = dma.hbm_to_vmem [thread:$0]  (!%p2609_p6), %s3269_s5, 2048, %s328_s28, [#allocation10], %s3236_s9, %s3236_s9, %s3238_s8  }
  0x3a   : > { %s43_s3 = sadd.s32 1, %s2447_s22  ;;  %s46_s27 = sadd.s32 1, %s2451_s23 }
  0x3b   : > { %p44_p1 = scmp.ge.s32.totalorder %s43_s3, 2  ;;  %p3248_p2 = scmp.eq.s32.totalorder %s2455_s24, 0 }
  0x3c   : > { %s81_s30 = sadd.s32 1, %s2423_s16  ;;  %p88_p4 = scmp.ne.s32.totalorder %s2423_s16, %s2419_s15 }
  0x3d   : > { %s3340_s3 = smov (%p44_p1, %s43_s3), 0  ;;  %s3342_s27 = smov (!%p44_p1, %s46_s27), %s2451_s23 }
  0x3e   : > { %3270 = sst [smem:[#allocation25_spill]] %s3340_s3  ;;  %s51_s6 = ssub.s32 %s2447_s22, %s3340_s3 }
  0x3f   : > { %p2651_p7 = por %p88_p4, %p3248_p2  ;;  %p48_p9 = scmp.ge.s32.totalorder %s3342_s27, 2 }
  0x40   : > { %p79_p10 = scmp.eq.s32.totalorder %s51_s6, 0  ;;  %p94_p11 = scmp.ne.s32.totalorder %s2419_s15, %s2415_s14 }
  0x41   : > { %p3247_p12 = scmp.lt.s32.totalorder %s2455_s24, 4  ;;  %s3344_s27 = smov (%p48_p9, %s3342_s27), 0 }
  0x42   : > { %3272 = sst [smem:[#allocation26_spill]] %s3344_s27  ;;  %s2665_s11 = ssub.s32 %s2451_s23, %s3344_s27 }
  0x43   : > { %s2661_s10 = scalar_select %p79_p10, %s2423_s16, %s81_s30  }
  0x44   : > { %p3274_p13 = scmp.eq.s32.totalorder %s2595_s25, 0  ;;  %s52_s8 = sor.u32 %s51_s6, %s2665_s11 }
  0x45   : > { %3273 = sst [smem:[#allocation27_spill]] %s2661_s10  ;;  %p2675_p5 = scmp.eq.s32.totalorder %s52_s8, 0 }
  0x46   : > { %p2669_p0 = por %p94_p11, %p3274_p13  ;;  %s383_s5 = sand.u32 1, %s2455_s24  }
  0x47   : > { %s3277_s14 = scalar_select %p2675_p5, 1, 0 }
  0x48   : > { %s3275_s9 = scalar_select %p2669_p0, 1, 0 }
  0x49   : > { %s385_s3 = sand.u32 1, %s2423_s16   ;;  %s1573_s30 = sshll.u32 %s2447_s22, 11 }
  0x4a   : > { %3276 = sst [smem:[#allocation28_spill]] %s3275_s9  ;;  %s1546_s20 = sshll.u32 %s385_s3, 7 }
  0x4b   : > { %s3278_s1 = sld [smem:[#allocation30_spill]]  ;;  %s387_s15 = scalar_lea.vmem [#allocation6], %s1546_s20 }
  0x4c   : > { %s394_s6 = sshll.u32 %s387_s15, 4  ;;  %p2691_p1 = pnand %p3247_p12, %p2651_p7  ;;  %s2695_s6 = int_to_ptr.vmem [resolvable:$true] %s394_s6 }
  0x4d   : > { %s2460_s3 = smov [#allocation11]   ;;  %s2699_s10 = scalar_lea.sflag [#allocation7], %s383_s5 }
  0x4e   : > { %s2697_s27 = sshll.u32 %s2460_s3, 4  ;;  %p2149_p9 = pneg %p2691_p1  ;;  %s344_s27 = int_to_ptr.vmem [resolvable:$true] %s2697_s27 }
  0x51   : > { %s2685_s21 = scalar_lea.hbm %s3278_s1, %s1573_s30  ;;  %s2152_s28 = scalar_lea.hbm %s3278_s1, 4096 }
  0x52   : > { %s2147_s30 = scalar_lea.hbm %s2685_s21, 2048  ;;  %p2153_p11 = scmp.lt.u32.totalorder %s2685_s21, %s3278_s1 }
  0x53   : > { %p2148_p4 = scmp.ne.s32.totalorder %s2685_s21, %s2147_s30  ;;  %p2154_p13 = scmp.lt.u32.totalorder %s2152_s28, %s2147_s30 }
  0x54   : > { %p2156_p12 = scmp.lt.u32.totalorder %s2147_s30, %s2685_s21 }
  0x55   : > { %p2150_p10 = pnand %p2149_p9, %p2148_p4  ;;  %p2155_p3 = por %p2154_p13, %p2153_p11 }
  0x57   : > { %p2151_p7 = pneg %p2150_p10  ;;  %p2157_p2 = por %p2156_p12, %p2155_p3 }
  0x59   : > { %p2158_p8 = pnand %p2157_p2, %p2151_p7 }
  0x5b   : > { %2161 = shalt.err (!%p2158_p8)
}
  0x5c   : > { %s2162_s5 = scalar_lea.vmem %s2695_s6, 2048  ;;  %s2461_s3 = smov [#allocation6]  }
  0x5d   : > { %p2163_p4 = scmp.ne.s32.totalorder %s2695_s6, %s2162_s5  ;;  %s2167_s15 = sshll.u32 %s2461_s3, 4  ;;  %s2168_s15 = int_to_ptr.vmem [resolvable:$false] %s2167_s15 }
  0x5e   : > { %s2169_s16 = scalar_lea.vmem %s2168_s15, 4096  ;;  %p2170_p5 = scmp.lt.s32.totalorder %s2695_s6, %s2168_s15 }
  0x5f   : > { %p2165_p10 = pnand %p2163_p4, %p2149_p9  ;;  %p2171_p11 = scmp.lt.s32.totalorder %s2169_s16, %s2162_s5 }
  0x61   : > { %p2166_p0 = pneg %p2165_p10  ;;  %p2172_p13 = por %p2171_p11, %p2170_p5 }
  0x63   : > { %p2173_p12 = pnand %p2172_p13, %p2166_p0 }
  0x65   : > { %2176 = shalt.err (!%p2173_p12)
}
  0x66   : > { %s3280_s9 = smov 8   ;;  %s3281_s30 = smov 128  }
  0x67   : > { %1983 = dma.hbm_to_vmem [thread:$0]  (!%p2691_p1), %s2685_s21, 2048, %s2695_s6, %s2699_s10, %s3281_s30, %s3281_s30, %s3280_s9  }
  0x68   : > { %s3282_s7 = sld [smem:[#allocation34_spill]]  ;;  %p3283_p2 = pneg %p2609_p6 }
  0x6e   : > { %s2177_s3 = scalar_lea.hbm %s3282_s7, 2048 }
  0x6f   : > { %p2178_p8 = scmp.ne.s32.totalorder %s3282_s7, %s2177_s3  ;;  %p2184_p5 = scmp.lt.u32.totalorder %s2177_s3, %s3282_s7 }
  0x71   : > { %p2180_p0 = pnand %p2178_p8, %p3283_p2 }
  0x73   : > { %p2181_p3 = pneg %p2180_p0 }
  0x75   : > { %p2186_p9 = pnand %p2184_p5, %p2181_p3 }
  0x77   : > { %2189 = shalt.err (!%p2186_p9)
}
  0x78   : > { %s2190_s21 = scalar_lea.vmem %s344_s27, 2048  ;;  %p3284_p7 = pmov %p3283_p2 }
  0x79   : > { %p2191_p1 = scmp.ne.s32.totalorder %s344_s27, %s2190_s21  ;;  %p2198_p11 = scmp.lt.s32.totalorder %s344_s27, %s344_s27 }
  0x7a   : > { %p2199_p13 = scmp.lt.s32.totalorder %s2190_s21, %s2190_s21 }
  0x7b   : > { %p2193_p4 = pnand %p2191_p1, %p3284_p7 }
  0x7c   : > { %p2200_p12 = por %p2199_p13, %p2198_p11 }
  0x7d   : > { %p2194_p10 = pneg %p2193_p4 }
  0x7f   : > { %p2201_p2 = pnand %p2200_p12, %p2194_p10 }
  0x81   : > { %2204 = shalt.err (!%p2201_p2)
}
  0x82   : > { %1976 = dma.hbm_to_vmem [thread:$0]  (!%p2609_p6), %s3282_s7, 2048, %s344_s27, [#allocation10], %s3281_s30, %s3281_s30, %s3280_s9  }
  0x83   : > { %s55_s29 = sadd.s32 1, %s2435_s19  ;;  %p3285_p8 = scmp.ne.s32.totalorder %s3277_s14, 0 }
  0x84   : > { %p62_p0 = scmp.ne.s32.totalorder %s2435_s19, %s2431_s18  ;;  %p68_p3 = scmp.ne.s32.totalorder %s2431_s18, %s2427_s17 }
  0x85   : > { %s2758_s28 = scalar_select %p3285_p8, %s2435_s19, %s55_s29  }
  0x86   : > { %s360_s3 = sand.u32 1, %s2435_s19   ;;  %s1572_s5 = sshll.u32 %s2451_s23, 5 }
  0x87   : > { %p3286_p5 = scmp.eq.s32.totalorder %s2455_s24, 0  ;;  %p3287_p1 = scmp.eq.s32.totalorder %s2595_s25, 0 }
  0x88   : > { %s1542_s8 = sshll.u32 %s360_s3, 7  ;;  %s370_s16 = sadd.s32 %s2447_s22, %s1572_s5 }
  0x89   : > { %p64_p9 = por %p3286_p5, %p62_p0  ;;  %p2770_p7 = por %p3287_p1, %p68_p3 }
  0x8a   : > { %s1545_s21 = sshll.u32 %s370_s16, 7  ;;  %s364_s27 = scalar_lea.vmem [#allocation3], %s1542_s8 }
  0x8b   : > { %s373_s6 = sshll.u32 %s364_s27, 4  ;;  %s3289_s0 = sld [smem:[#allocation29_spill]]  ;;  %s2780_s6 = int_to_ptr.vmem [resolvable:$true] %s373_s6 }
  0x8c   : > { %p3290_p6 = scmp.lt.s32.totalorder %s2455_s24, 4  ;;  %s2788_s5 = scalar_lea.sflag [#allocation4], %s360_s3 }
  0x8e   : > { %p2784_p4 = pnand %p3290_p6, %p64_p9 }
  0x90   : > { %p2207_p11 = pneg %p2784_p4 }
  0x91   : > { %s2778_s29 = scalar_lea.hbm %s3289_s0, %s1545_s21  ;;  %s2210_s27 = scalar_lea.hbm %s3289_s0, 8192 }
  0x92   : > { %s2205_s8 = scalar_lea.hbm %s2778_s29, 2048  ;;  %p2211_p2 = scmp.lt.u32.totalorder %s2778_s29, %s3289_s0 }
  0x93   : > { %p2206_p10 = scmp.ne.s32.totalorder %s2778_s29, %s2205_s8  ;;  %p2212_p8 = scmp.lt.u32.totalorder %s2210_s27, %s2205_s8 }
  0x94   : > { %p2214_p3 = scmp.lt.u32.totalorder %s2205_s8, %s2778_s29 }
  0x95   : > { %p2208_p13 = pnand %p2207_p11, %p2206_p10  ;;  %p2213_p0 = por %p2212_p8, %p2211_p2 }
  0x97   : > { %p2209_p12 = pneg %p2208_p13  ;;  %p2215_p5 = por %p2214_p3, %p2213_p0 }
  0x99   : > { %p2216_p9 = pnand %p2215_p5, %p2209_p12 }
  0x9b   : > { %2219 = shalt.err (!%p2216_p9)
}
  0x9c   : > { %s2220_s3 = scalar_lea.vmem %s2780_s6, 2048  ;;  %s2462_s16 = smov [#allocation3]  }
  0x9d   : > { %p2221_p1 = scmp.ne.s32.totalorder %s2780_s6, %s2220_s3  ;;  %s2225_s21 = sshll.u32 %s2462_s16, 4  ;;  %s2226_s21 = int_to_ptr.vmem [resolvable:$false] %s2225_s21 }
  0x9e   : > { %s2227_s20 = scalar_lea.vmem %s2226_s21, 4096  ;;  %p2228_p13 = scmp.lt.s32.totalorder %s2780_s6, %s2226_s21 }
  0x9f   : > { %p2223_p6 = pnand %p2221_p1, %p2207_p11  ;;  %p2229_p2 = scmp.lt.s32.totalorder %s2227_s20, %s2220_s3 }
  0xa1   : > { %p2224_p10 = pneg %p2223_p6  ;;  %p2230_p8 = por %p2229_p2, %p2228_p13 }
  0xa3   : > { %p2231_p0 = pnand %p2230_p8, %p2224_p10 }
  0xa5   : > { %2234 = shalt.err (!%p2231_p0)
}
  0xa6   : > { %s2463_s8 = smov 256   ;;  %s1537_s17 = sadd.s32 4294967294, %s2455_s24  }
  0xa7   : > { %1980 = dma.hbm_to_vmem [thread:$0]  (!%p2784_p4), %s2778_s29, 2048, %s2780_s6, %s2788_s5, %s2463_s8, %s3281_s30, %s3280_s9  }
  0xa8   : > { %s107_s27 = sadd.s32 1, %s2411_s13  ;;  %p114_p11 = scmp.ne.s32.totalorder %s2411_s13, %s2407_s12 }
  0xa9   : > { %p3292_p12 = scmp.eq.s32.totalorder %s2665_s11, 0  ;;  %p3293_p3 = scmp.eq.s32.totalorder %s2455_s24, 0 }
  0xaa   : > { %p120_p9 = scmp.ne.s32.totalorder %s2407_s12, %s2403_s4  ;;  %p3295_p1 = scmp.eq.s32.totalorder %s2595_s25, 3 }
  0xab   : > { %s2825_s14 = scalar_select %p3292_p12, %s2411_s13, %s107_s27  }
  0xac   : > { %p2829_p5 = por %p114_p11, %p3293_p3  ;;  %p2837_p6 = por %p3295_p1, %p114_p11 }
  0xad   : > { %p276_p4 = scmp.eq.s32.totalorder %s1537_s17, 3  ;;  %p3297_p10 = scmp.eq.s32.totalorder %s2595_s25, 0 }
  0xae   : > { %s3296_s16 = scalar_select %p2837_p6, 1, 0 }
  0xaf   : > { %p2843_p13 = por %p120_p9, %p3297_p10  ;;  %s406_s11 = sand.u32 1, %s2411_s13  }
  0xb0   : > { %p2848_p2 = por %p276_p4, %p120_p9  ;;  %s1549_s5 = sshll.u32 %s406_s11, 7 }
  0xb1   : > { %s3298_s6 = scalar_select %p2843_p13, 1, 0 }
  0xb2   : > { %s3299_s29 = scalar_select %p2848_p2, 1, 0 }
  0xb3   : > { %s1574_s21 = sshll.u32 %s2451_s23, 11  ;;  %s3300_s2 = sld [smem:[#allocation31_spill]] }
  0xb4   : > { %s408_s17 = scalar_lea.vmem [#allocation8], %s1549_s5  ;;  %p3301_p8 = scmp.lt.s32.totalorder %s2455_s24, 4 }
  0xb5   : > { %s415_s0 = sshll.u32 %s408_s17, 4  ;;  %s2858_s0 = int_to_ptr.vmem [resolvable:$true] %s415_s0 }
  0xb6   : > { %p2864_p0 = pnand %p3301_p8, %p2829_p5 }
  0xb8   : > { %p2237_p12 = pneg %p2864_p0 }
  0xb9   : > { %s2856_s27 = scalar_lea.hbm %s3300_s2, %s1574_s21  ;;  %s2240_s20 = scalar_lea.hbm %s3300_s2, 4096 }
  0xba   : > { %s2235_s11 = scalar_lea.hbm %s2856_s27, 2048  ;;  %p2241_p5 = scmp.lt.u32.totalorder %s2856_s27, %s3300_s2 }
  0xbb   : > { %p2236_p11 = scmp.ne.s32.totalorder %s2856_s27, %s2235_s11  ;;  %p2242_p1 = scmp.lt.u32.totalorder %s2240_s20, %s2235_s11 }
  0xbc   : > { %p2244_p10 = scmp.lt.u32.totalorder %s2235_s11, %s2856_s27 }
  0xbd   : > { %p2238_p3 = pnand %p2237_p12, %p2236_p11  ;;  %p2243_p4 = por %p2242_p1, %p2241_p5 }
  0xbf   : > { %p2239_p9 = pneg %p2238_p3  ;;  %p2245_p8 = por %p2244_p10, %p2243_p4 }
  0xc1   : > { %p2246_p2 = pnand %p2245_p8, %p2239_p9 }
  0xc3   : > { %2249 = shalt.err (!%p2246_p2)
}
  0xc4   : > { %s2250_s17 = scalar_lea.vmem %s2858_s0, 2048  ;;  %s2464_s5 = smov [#allocation8]  }
  0xc5   : > { %p2251_p11 = scmp.ne.s32.totalorder %s2858_s0, %s2250_s17  ;;  %s2255_s21 = sshll.u32 %s2464_s5, 4  ;;  %s2256_s21 = int_to_ptr.vmem [resolvable:$false] %s2255_s21 }
  0xc6   : > { %s2257_s3 = scalar_lea.vmem %s2256_s21, 4096  ;;  %p2258_p13 = scmp.lt.s32.totalorder %s2858_s0, %s2256_s21 }
  0xc7   : > { %p2253_p3 = pnand %p2251_p11, %p2237_p12  ;;  %p2259_p5 = scmp.lt.s32.totalorder %s2257_s3, %s2250_s17 }
  0xc9   : > { %p2254_p6 = pneg %p2253_p3  ;;  %p2260_p1 = por %p2259_p5, %p2258_p13 }
  0xcb   : > { %p2261_p4 = pnand %p2260_p1, %p2254_p6 }
  0xcd   : > { %2264 = shalt.err (!%p2261_p4)
}
  0xce   : > { %1986 = dma.hbm_to_vmem [thread:$0]  (!%p2864_p0), %s2856_s27, 2048, %s2858_s0, %s2699_s10, %s3281_s30, %s3281_s30, %s3280_s9  }
  0xcf   : > { %p3303_p2 = scmp.ne.s32.totalorder %s3267_s26, 0 }
  0xd0   : > { %s429_s11 = sand.u32 (!%p3303_p2), 1, %s2431_s18  }
  0xd1   : > { %427 = sbr.rel (%p3303_p2) target bundleno = 1071 (0x42f), region = 56  ;;  %s1553_s20 = sshll.u32 (!%p3303_p2), %s429_s11, 7 }
  0xd2   : > { %s430_s8 = scalar_lea.sflag (!%p3303_p2), [#allocation4], %s429_s11  ;;  %s2900_s17 = scalar_lea.vmem (!%p3303_p2), [#allocation3], %s1553_s20 }
  0xd8   : > { %2378 = dma.done.wait (%p2770_p7), %s430_s8, 2048  }
  0xd9   : > { %2380 = vsyncadd (%p2770_p7), %s430_s8, 4294965248  ;;  %s3304_s1 = sld [smem:[#allocation21_spill]]  ;;  %s3305_s5 = sld [smem:[#allocation28_spill]] }
  0xda   : > { %s438_s21 = sand.u32 1, %s2595_s25  }
  0xdb   : > { %s439_s26 = scalar_lea.sflag [#allocation7], %s438_s21 }
  0xdf   : > { %s440_s0 = sand.u32 1, %s3304_s1   ;;  %p3306_p6 = scmp.ne.s32.totalorder %s3305_s5, 0 }
  0xe0   : > { %s1554_s10 = sshll.u32 %s440_s0, 7 }
  0xe1   : > { %s2908_s9 = scalar_lea.vmem [#allocation6], %s1554_s10 }
  0xe2   : > { %2382 = dma.done.wait (%p3306_p6), %s439_s26, 2048  }
  0xe3   : > { %2384 = vsyncadd (%p3306_p6), %s439_s26, 4294965248  ;;  %s2915_s30 = sand.u32 1, %s2407_s12   ;;  %p3307_p7 = scmp.ne.s32.totalorder %s3298_s6, 0 }
  0xe4   : > { %s1555_s15 = sshll.u32 %s2915_s30, 7 }
  0xe5   : > { %s2920_s27 = scalar_lea.vmem [#allocation8], %s1555_s15 }
  0xe6   : > { %2386 = dma.done.wait (%p3307_p7), %s439_s26, 2048  }
  0xe7   : > { %2388 = vsyncadd (%p3307_p7), %s439_s26, 4294965248  ;;  %p3308_p13 = scmp.eq.s32.totalorder %s2595_s25, 0 }
  0xe9   : > { %2390 = dma.done.wait (%p3308_p13), [#allocation10], 4096   ;;  %p3309_p0 = pmov %p3308_p13 }
  0xea   : > { %s3310_s3 = sld [smem:[#allocation24_spill]]  ;;  %s1559_s11 = sshll.u32 %s2915_s30, 1  ;;  %v516_v0 = vlaneseq }
  0xeb   : > { %2392 = vsyncadd (%p3309_p0), [#allocation10], 4294963200  ;;  %s2982_s25 = scalar_lea.vmem [#allocation12], %s1555_s15  ;;  %s2986_s6 = scalar_lea.vmem [#allocation13], %s1559_s11 }
  0xec   : > { %v517_v1 = vshrl.u32 %v516_v0, 7  ;;  %s3311_s8 = sld [smem:[#allocation23_spill]] }
  0xee   : > { %v518_v3 = vadd.s32 8, %v517_v1  ;;  %v519_v4 = vadd.s32 16, %v517_v1  ;;  %v520_v5 = vadd.s32 24, %v517_v1  ;;  %v521_v6 = vadd.s32 32, %v517_v1 }
  0xef   : > { %v522_v7 = vadd.s32 40, %v517_v1  ;;  %v523_v8 = vadd.s32 48, %v517_v1  ;;  %v524_v9 = vadd.s32 56, %v517_v1  ;;  %v525_v10 = vadd.s32 64, %v517_v1 }
  0xf0   : > { %s1560_s20 = sshll.u32 %s3310_s3, 7  ;;  %v526_v11 = vadd.s32 72, %v517_v1  ;;  %v527_v12 = vadd.s32 80, %v517_v1  ;;  %v528_v13 = vadd.s32 88, %v517_v1  ;;  %v529_v14 = vadd.s32 96, %v517_v1 }
  0xf1   : > { %v533_v2 = vstv %s1560_s20  ;;  %v530_v15 = vadd.s32 104, %v517_v1  ;;  %v531_v16 = vadd.s32 112, %v517_v1  ;;  %v532_v17 = vadd.s32 120, %v517_v1 }
  0xf2   : > { %v2932_v18 = vadd.s32 %v533_v2, %v517_v1  ;;  %v2934_v19 = vadd.s32 %v533_v2, %v518_v3  ;;  %v2936_v20 = vadd.s32 %v533_v2, %v519_v4  ;;  %v2938_v21 = vadd.s32 %v533_v2, %v520_v5  ;;  %p1561_p12 = scmp.ne.s32.totalorder %s3311_s8, 0 }
  0xf3   : > { %v2940_v22 = vadd.s32 %v533_v2, %v521_v6  ;;  %v2942_v23 = vadd.s32 %v533_v2, %v522_v7  ;;  %v2944_v24 = vadd.s32 %v533_v2, %v523_v8  ;;  %v2946_v25 = vadd.s32 %v533_v2, %v524_v9  ;;  %v570_v34 = vld [vmem:[%s2920_s27] sm:$0xff] (!%p1561_p12)  ;;  %v571_v35 = vld [vmem:[%s2920_s27 + $0x8] sm:$0xff] (!%p1561_p12)  ;;  %v572_v36 = vld [vmem:[%s2920_s27 + $0x10] sm:$0xff] (!%p1561_p12) }
  0xf4   : > { %v2948_v26 = vadd.s32 %v533_v2, %v525_v10  ;;  %v2950_v27 = vadd.s32 %v533_v2, %v526_v11  ;;  %v2952_v28 = vadd.s32 %v533_v2, %v527_v12  ;;  %v2954_v29 = vadd.s32 %v533_v2, %v528_v13  ;;  %569 = sbr.rel (%p1561_p12) target bundleno = 254 (0xfe), region = 80  ;;  %586 = vst [vmem:[#allocation2] sm:$0xff] (!%p1561_p12), %v570_v34  ;;  %v573_v37 = vld [vmem:[%s2920_s27 + $0x18] sm:$0xff] (!%p1561_p12)  ;;  %v574_v38 = vld [vmem:[%s2920_s27 + $0x20] sm:$0xff] (!%p1561_p12)  ;;  %v575_v39 = vld [vmem:[%s2920_s27 + $0x28] sm:$0xff] (!%p1561_p12) }
  0xf5   : > { %v2956_v30 = vadd.s32 %v533_v2, %v529_v14  ;;  %v2958_v31 = vadd.s32 %v533_v2, %v530_v15  ;;  %v2960_v32 = vadd.s32 %v533_v2, %v531_v16  ;;  %v2962_v33 = vadd.s32 %v533_v2, %v532_v17  ;;  %587 = vst [vmem:[#allocation2 + $0x8] sm:$0xff] (!%p1561_p12), %v571_v35  ;;  %v576_v40 = vld [vmem:[%s2920_s27 + $0x30] sm:$0xff] (!%p1561_p12)  ;;  %v577_v41 = vld [vmem:[%s2920_s27 + $0x38] sm:$0xff] (!%p1561_p12)  ;;  %v578_v42 = vld [vmem:[%s2920_s27 + $0x40] sm:$0xff] (!%p1561_p12) }
  0xf6   : > { %vm550_vm0 = vcmp.lt.s32.totalorder %v2932_v18, 200  ;;  %vm551_vm1 = vcmp.lt.s32.totalorder %v2934_v19, 200  ;;  %vm552_vm2 = vcmp.lt.s32.totalorder %v2936_v20, 200  ;;  %vm553_vm3 = vcmp.lt.s32.totalorder %v2938_v21, 200  ;;  %588 = vst [vmem:[#allocation2 + $0x10] sm:$0xff] (!%p1561_p12), %v572_v36  ;;  %589 = vst [vmem:[#allocation2 + $0x18] sm:$0xff] (!%p1561_p12), %v573_v37 }
  0xf7   : > { %vm554_vm4 = vcmp.lt.s32.totalorder %v2940_v22, 200  ;;  %vm555_vm5 = vcmp.lt.s32.totalorder %v2942_v23, 200  ;;  %vm556_vm6 = vcmp.lt.s32.totalorder %v2944_v24, 200  ;;  %vm557_vm7 = vcmp.lt.s32.totalorder %v2946_v25, 200  ;;  %590 = vst [vmem:[#allocation2 + $0x20] sm:$0xff] (!%p1561_p12), %v574_v38  ;;  %591 = vst [vmem:[#allocation2 + $0x28] sm:$0xff] (!%p1561_p12), %v575_v39 }
  0xf8   : > { %vm558_vm8 = vcmp.lt.s32.totalorder %v2948_v26, 200  ;;  %vm559_vm9 = vcmp.lt.s32.totalorder %v2950_v27, 200  ;;  %vm560_vm10 = vcmp.lt.s32.totalorder %v2952_v28, 200  ;;  %vm561_vm11 = vcmp.lt.s32.totalorder %v2954_v29, 200  ;;  %592 = vst [vmem:[#allocation2 + $0x30] sm:$0xff] (!%p1561_p12), %v576_v40  ;;  %593 = vst [vmem:[#allocation2 + $0x38] sm:$0xff] (!%p1561_p12), %v577_v41 }
  0xf9   : > { %vm562_vm12 = vcmp.lt.s32.totalorder %v2956_v30, 200  ;;  %vm563_vm13 = vcmp.lt.s32.totalorder %v2958_v31, 200  ;;  %vm564_vm14 = vcmp.lt.s32.totalorder %v2960_v32, 200  ;;  %vm565_vm15 = vcmp.lt.s32.totalorder %v2962_v33, 200  ;;  %594 = vst [vmem:[#allocation2 + $0x40] sm:$0xff] (!%p1561_p12), %v578_v42  ;;  %v579_v43 = vld [vmem:[%s2920_s27 + $0x48] sm:$0xff] (!%p1561_p12) }
  0xfa   : > { %v580_v44 = vld [vmem:[%s2920_s27 + $0x50] sm:$0xff] (!%p1561_p12)  ;;  %v581_v45 = vld [vmem:[%s2920_s27 + $0x58] sm:$0xff] (!%p1561_p12)  ;;  %595 = vst [vmem:[#allocation2 + $0x48] sm:$0xff] (!%p1561_p12), %v579_v43  ;;  %v582_v46 = vld [vmem:[%s2920_s27 + $0x60] sm:$0xff] (!%p1561_p12) }
  0xfb   : > { %596 = vst [vmem:[#allocation2 + $0x50] sm:$0xff] %v580_v44  ;;  %597 = vst [vmem:[#allocation2 + $0x58] sm:$0xff] %v581_v45  ;;  %v583_v47 = vld [vmem:[%s2920_s27 + $0x68] sm:$0xff]  ;;  %v584_v48 = vld [vmem:[%s2920_s27 + $0x70] sm:$0xff] }
  0xfc   : > { %598 = vst [vmem:[#allocation2 + $0x60] sm:$0xff] %v582_v46  ;;  %599 = vst [vmem:[#allocation2 + $0x68] sm:$0xff] %v583_v47  ;;  %v585_v49 = vld [vmem:[%s2920_s27 + $0x78] sm:$0xff] }
  0xfd   : > { %600 = vst [vmem:[#allocation2 + $0x70] sm:$0xff] %v584_v48  ;;  %601 = vst [vmem:[#allocation2 + $0x78] sm:$0xff] %v585_v49 }
  0xfe PF: > { %v634_v50 = vld [vmem:[%s2908_s9] sm:$0xff]  ;;  %v635_v51 = vld [vmem:[%s2908_s9 + $0x8] sm:$0xff]  ;;  %v636_v52 = vld [vmem:[%s2908_s9 + $0x10] sm:$0xff] }
  0xff   : > { %v1840_v53 = vpack.c.bf16 %v635_v51, %v634_v50  ;;  %v637_v54 = vld [vmem:[%s2908_s9 + $0x18] sm:$0xff]  ;;  %v638_v56 = vld [vmem:[%s2908_s9 + $0x20] sm:$0xff]  ;;  %v639_v57 = vld [vmem:[%s2908_s9 + $0x28] sm:$0xff] }
 0x100   : > { %v1844_v55 = vpack.c.bf16 %v637_v54, %v636_v52  ;;  %v1848_v58 = vpack.c.bf16 %v639_v57, %v638_v56  ;;  %v618_v59 = vld [vmem:[%s2900_s17] sm:$0xff]  ;;  %v640_v61 = vld [vmem:[%s2908_s9 + $0x30] sm:$0xff]  ;;  %v641_v62 = vld [vmem:[%s2908_s9 + $0x38] sm:$0xff] }
 0x101   : > { %1841 = vmatprep.subr.bf16.mxu0 %v1840_v53  ;;  %1936 = vmatprep.subr.bf16.mxu1 %v1840_v53  ;;  %v626_v60 = vld [vmem:[%s2900_s17 + $0x40] sm:$0xff]  ;;  %v1852_v63 = vpack.c.bf16 %v641_v62, %v640_v61  ;;  %v643_v1 = vld [vmem:[%s2908_s9 + $0x48] sm:$0xff]  ;;  %v644_v3 = vld [vmem:[%s2908_s9 + $0x50] sm:$0xff] }
 0x102   : > { %1843 = vmatpush3.bf16.msra.mxu0 %v1840_v53  ;;  %1944 = vmatpush3.bf16.msra.mxu1 %v1840_v53  ;;  %v642_v0 = vld [vmem:[%s2908_s9 + $0x40] sm:$0xff]  ;;  %v645_v4 = vld [vmem:[%s2908_s9 + $0x58] sm:$0xff]  ;;  %v647_v7 = vld [vmem:[%s2908_s9 + $0x68] sm:$0xff] }
 0x103   : > { %1845 = vmatprep.subr.bf16.mxu0 %v1844_v55  ;;  %1937 = vmatprep.subr.bf16.mxu1 %v1844_v55  ;;  %v1856_v2 = vpack.c.bf16 %v643_v1, %v642_v0  ;;  %v1860_v5 = vpack.c.bf16 %v645_v4, %v644_v3  ;;  %v646_v6 = vld [vmem:[%s2908_s9 + $0x60] sm:$0xff]  ;;  %v648_v9 = vld [vmem:[%s2908_s9 + $0x70] sm:$0xff]  ;;  %v649_v10 = vld [vmem:[%s2908_s9 + $0x78] sm:$0xff] }
 0x104   : > { %1704 = vmatprep.mubr.f32.mxu0 %v618_v59  ;;  %1716 = vmatprep.mubr.f32.mxu1 %v626_v60  ;;  %v1864_v8 = vpack.c.bf16 %v647_v7, %v646_v6  ;;  %v1868_v11 = vpack.c.bf16 %v649_v10, %v648_v9  ;;  %v619_v12 = vld [vmem:[%s2900_s17 + $0x8] sm:$0xff]  ;;  %v620_v14 = vld [vmem:[%s2900_s17 + $0x10] sm:$0xff]  ;;  %v621_v16 = vld [vmem:[%s2900_s17 + $0x18] sm:$0xff] }
 0x105   : > { %v627_v13 = vld [vmem:[%s2900_s17 + $0x48] sm:$0xff]  ;;  %v628_v15 = vld [vmem:[%s2900_s17 + $0x50] sm:$0xff]  ;;  %v629_v17 = vld [vmem:[%s2900_s17 + $0x58] sm:$0xff] }
 0x106   : > { %1847 = vmatpush3.bf16.msra.mxu0 %v1844_v55  ;;  %1945 = vmatpush3.bf16.msra.mxu1 %v1844_v55  ;;  %v622_v34 = vld [vmem:[%s2900_s17 + $0x20] sm:$0xff]  ;;  %v623_v36 = vld [vmem:[%s2900_s17 + $0x28] sm:$0xff]  ;;  %v624_v38 = vld [vmem:[%s2900_s17 + $0x30] sm:$0xff] }
 0x107   : > { %1849 = vmatprep.subr.bf16.mxu0 %v1848_v58  ;;  %1938 = vmatprep.subr.bf16.mxu1 %v1848_v58  ;;  %v630_v35 = vld [vmem:[%s2900_s17 + $0x60] sm:$0xff]  ;;  %v631_v37 = vld [vmem:[%s2900_s17 + $0x68] sm:$0xff]  ;;  %v632_v39 = vld [vmem:[%s2900_s17 + $0x70] sm:$0xff] }
 0x108   : > { %v625_v40 = vld [vmem:[%s2900_s17 + $0x38] sm:$0xff]  ;;  %v603_v42 = vld [vmem:[#allocation2 + $0x8] sm:$0xff]  ;;  %v602_v44 = vld [vmem:[#allocation2] sm:$0xff] }
 0x109   : > { %v633_v41 = vld [vmem:[%s2900_s17 + $0x78] sm:$0xff]  ;;  %v611_v43 = vld [vmem:[#allocation2 + $0x48] sm:$0xff]  ;;  %v610_v45 = vld [vmem:[#allocation2 + $0x40] sm:$0xff]  ;;  %s3312_s17 = sld [smem:[#allocation23_spill]] }
 0x10a   : > { %1851 = vmatpush3.bf16.msra.mxu0 %v1848_v58  ;;  %1946 = vmatpush3.bf16.msra.mxu1 %v1848_v58  ;;  %v605_v54 = vld [vmem:[#allocation2 + $0x18] sm:$0xff]  ;;  %v604_v56 = vld [vmem:[#allocation2 + $0x10] sm:$0xff]  ;;  %v615_v3 = vld [vmem:[#allocation2 + $0x68] sm:$0xff] }
 0x10b   : > { %1853 = vmatprep.subr.bf16.mxu0 %v1852_v63  ;;  %1939 = vmatprep.subr.bf16.mxu1 %v1852_v63  ;;  %v613_v55 = vld [vmem:[#allocation2 + $0x58] sm:$0xff]  ;;  %v612_v57 = vld [vmem:[#allocation2 + $0x50] sm:$0xff]  ;;  %v606_v4 = vld [vmem:[#allocation2 + $0x20] sm:$0xff] }
 0x10e   : > { %1855 = vmatpush3.bf16.msra.mxu0 %v1852_v63  ;;  %1947 = vmatpush3.bf16.msra.mxu1 %v1852_v63 }
 0x10f   : > { %1857 = vmatprep.subr.bf16.mxu0 %v1856_v2  ;;  %1940 = vmatprep.subr.bf16.mxu1 %v1856_v2  ;;  %p1562_p9 = scmp.ne.s32.totalorder %s3312_s17, 1 }
 0x110   : > { %s3313_s21 = sld [smem:[#allocation33_spill]] (!%p1562_p9)  ;;  %s3314_s26 = sld [smem:[#allocation35_spill]] (!%p1562_p9) }
 0x112   : > { %1859 = vmatpush3.bf16.msra.mxu0 %v1856_v2  ;;  %1948 = vmatpush3.bf16.msra.mxu1 %v1856_v2  ;;  %v607_v2 = vld [vmem:[#allocation2 + $0x28] sm:$0xff] }
 0x113   : > { %1861 = vmatprep.subr.bf16.mxu0 %v1860_v5  ;;  %1941 = vmatprep.subr.bf16.mxu1 %v1860_v5 }
 0x116   : > { %1863 = vmatpush3.bf16.msra.mxu0 %v1860_v5  ;;  %1949 = vmatpush3.bf16.msra.mxu1 %v1860_v5  ;;  %v614_v5 = vld [vmem:[#allocation2 + $0x60] sm:$0xff] }
 0x117   : > { %1865 = vmatprep.subr.bf16.mxu0 %v1864_v8  ;;  %1942 = vmatprep.subr.bf16.mxu1 %v1864_v8 }
 0x11a   : > { %1867 = vmatpush3.bf16.msra.mxu0 %v1864_v8  ;;  %1950 = vmatpush3.bf16.msra.mxu1 %v1864_v8 }
 0x11b   : > { %1869 = vmatprep.subr.bf16.mxu0 %v1868_v11  ;;  %1943 = vmatprep.subr.bf16.mxu1 %v1868_v11 }
 0x11e   : > { %1871 = vmatpush3.bf16.msra.mxu0 %v1868_v11  ;;  %1951 = vmatpush3.bf16.msra.mxu1 %v1868_v11 }
 0x121   : > { %1705 = vmatmul.mubr.f32.vlgmr.msra.gmra.mrb[0].mxu0 %v619_v12  ;;  %1717 = vmatmul.mubr.f32.vlgmr.msra.gmra.mrb[0].mxu1 %v627_v13 }
 0x122   : > { %1707 = vmatprep.mubr.f32.mxu0 %v620_v14  ;;  %1719 = vmatprep.mubr.f32.mxu1 %v628_v15  ;;  %v609_v14 = vld [vmem:[#allocation2 + $0x38] sm:$0xff] }
 0x123   : > { %v617_v15 = vld [vmem:[#allocation2 + $0x78] sm:$0xff] }
 0x125   : > { %1708 = vmatmul.mubr.f32.gmra.mrb[2].mxu0 %v621_v16  ;;  %1720 = vmatmul.mubr.f32.gmra.mrb[2].mxu1 %v629_v17  ;;  %v608_v16 = vld [vmem:[#allocation2 + $0x30] sm:$0xff] }
 0x126   : > { %1710 = vmatprep.mubr.f32.mxu0 %v622_v34  ;;  %1722 = vmatprep.mubr.f32.mxu1 %v630_v35  ;;  %v616_v17 = vld [vmem:[#allocation2 + $0x70] sm:$0xff] }
 0x129   : > { %1711 = vmatmul.mubr.f32.gmra.mrb[4].mxu0 %v623_v36  ;;  %1723 = vmatmul.mubr.f32.gmra.mrb[4].mxu1 %v631_v37 }
 0x12a   : > { %1713 = vmatprep.mubr.f32.mxu0 %v624_v38  ;;  %1725 = vmatprep.mubr.f32.mxu1 %v632_v39 }
 0x12d   : > { %1714 = vmatmul.mubr.f32.gmra.mrb[6].mxu0 %v625_v40  ;;  %1726 = vmatmul.mubr.f32.gmra.mrb[6].mxu1 %v633_v41 }
 0x1f4   : > { %v1706_v46 = vpop.f32.mrb[0].mxu0  ;;  %v1718_v47 = vpop.f32.mrb[0].mxu1 }
 0x1f5   : > { %v796_v48 = vadd.f32 %v1706_v46, %v603_v42  ;;  %v804_v49 = vadd.f32 %v1718_v47, %v611_v43  ;;  %v716_v50 = vpop.f32.mrb[1].mxu0  ;;  %v756_v51 = vpop.f32.mrb[1].mxu1  ;;  %v847_v42 = vld [vmem:[#allocation9] sm:$0xff] (!%p1562_p9)  ;;  %v848_v43 = vld [vmem:[#allocation9 + $0x8] sm:$0xff] (!%p1562_p9)  ;;  %v850_v46 = vld [vmem:[#allocation9 + $0x18] sm:$0xff] (!%p1562_p9) }
 0x1f6   : > { %v795_v52 = vadd.f32 %v716_v50, %v602_v44  ;;  %v803_v53 = vadd.f32 %v756_v51, %v610_v45  ;;  %v849_v44 = vld [vmem:[#allocation9 + $0x10] sm:$0xff] (!%p1562_p9)  ;;  %v1872_v45 = vpack.c.bf16 (!%p1562_p9), %v848_v43, %v847_v42 }
 0x1f7   : > { %812 = vst [vmem:[#allocation2 + $0x8] sm:$0xff] %v796_v48  ;;  %820 = vst [vmem:[#allocation2 + $0x48] sm:$0xff] %v804_v49  ;;  %v1876_v47 = vpack.c.bf16 (!%p1562_p9), %v850_v46, %v849_v44  ;;  %v851_v48 = vld [vmem:[#allocation9 + $0x20] sm:$0xff] (!%p1562_p9)  ;;  %v852_v49 = vld [vmem:[#allocation9 + $0x28] sm:$0xff] (!%p1562_p9) }
 0x1f8   : > { %811 = vst [vmem:[#allocation2] sm:$0xff] %v795_v52  ;;  %819 = vst [vmem:[#allocation2 + $0x40] sm:$0xff] %v803_v53  ;;  %v1709_v58 = vpop.f32.mrb[2].mxu0  ;;  %v1721_v59 = vpop.f32.mrb[2].mxu1  ;;  %1873 = vmatprep.subr.bf16.mxu0 (!%p1562_p9), %v1872_v45  ;;  %v1880_v50 = vpack.c.bf16 (!%p1562_p9), %v852_v49, %v851_v48  ;;  %v853_v52 = vld [vmem:[#allocation9 + $0x30] sm:$0xff] (!%p1562_p9)  ;;  %v854_v53 = vld [vmem:[#allocation9 + $0x38] sm:$0xff] (!%p1562_p9) }
 0x1f9   : > { %v798_v60 = vadd.f32 %v1709_v58, %v605_v54  ;;  %v806_v61 = vadd.f32 %v1721_v59, %v613_v55  ;;  %v726_v62 = vpop.f32.mrb[3].mxu0  ;;  %v766_v63 = vpop.f32.mrb[3].mxu1  ;;  %1875 = vmatpush3.bf16.msra.mxu0 (!%p1562_p9), %v1872_v45  ;;  %v1884_v54 = vpack.c.bf16 (!%p1562_p9), %v854_v53, %v853_v52  ;;  %v855_v55 = vld [vmem:[#allocation9 + $0x40] sm:$0xff] (!%p1562_p9)  ;;  %v1032_v58 = vld [vmem:[#allocation11 + $0x8] sm:$0xff] (!%p1562_p9)  ;;  %v1033_v59 = vld [vmem:[#allocation11 + $0x10] sm:$0xff] (!%p1562_p9) }
 0x1fa   : > { %v797_v0 = vadd.f32 %v726_v62, %v604_v56  ;;  %v805_v1 = vadd.f32 %v766_v63, %v612_v57  ;;  %1877 = vmatprep.subr.bf16.mxu0 (!%p1562_p9), %v1876_v47  ;;  %v856_v56 = vld [vmem:[#allocation9 + $0x48] sm:$0xff] (!%p1562_p9)  ;;  %v1031_v57 = vld [vmem:[#allocation11] sm:$0xff] (!%p1562_p9) }
 0x1fb   : > { %814 = vst [vmem:[#allocation2 + $0x18] sm:$0xff] %v798_v60  ;;  %822 = vst [vmem:[#allocation2 + $0x58] sm:$0xff] %v806_v61  ;;  %v1034_v60 = vld [vmem:[#allocation11 + $0x18] sm:$0xff] (!%p1562_p9)  ;;  %v1904_v61 = vpack.c.bf16 (!%p1562_p9), %v1032_v58, %v1031_v57  ;;  %v1888_v63 = vpack.c.bf16 (!%p1562_p9), %v856_v56, %v855_v55  ;;  %v1045_v55 = vld [vmem:[#allocation11 + $0x70] sm:$0xff] (!%p1562_p9) }
 0x1fc   : > { %813 = vst [vmem:[#allocation2 + $0x10] sm:$0xff] %v797_v0  ;;  %821 = vst [vmem:[#allocation2 + $0x50] sm:$0xff] %v805_v1  ;;  %v1712_v6 = vpop.f32.mrb[4].mxu0  ;;  %v1724_v7 = vpop.f32.mrb[4].mxu1  ;;  %v1908_v62 = vpack.c.bf16 (!%p1562_p9), %v1034_v60, %v1033_v59  ;;  %v1035_v0 = vld [vmem:[#allocation11 + $0x20] sm:$0xff] (!%p1562_p9)  ;;  %v1036_v1 = vld [vmem:[#allocation11 + $0x28] sm:$0xff] (!%p1562_p9) }
 0x1fd   : > { %v800_v8 = vadd.f32 %v1712_v6, %v607_v2  ;;  %v808_v9 = vadd.f32 %v1724_v7, %v615_v3  ;;  %v736_v10 = vpop.f32.mrb[5].mxu0  ;;  %v776_v11 = vpop.f32.mrb[5].mxu1  ;;  %1879 = vmatpush3.bf16.msra.mxu0 (!%p1562_p9), %v1876_v47  ;;  %v857_v2 = vld [vmem:[#allocation9 + $0x50] sm:$0xff] (!%p1562_p9)  ;;  %v858_v3 = vld [vmem:[#allocation9 + $0x58] sm:$0xff] (!%p1562_p9)  ;;  %1905 = vmatprep.subr.bf16.mxu1 (!%p1562_p9), %v1904_v61  ;;  %v1563_v58 = vld [vmem:[%s3313_s21] ss:$0 sm:$0xff] (!%p1562_p9) }
 0x1fe   : > { %v799_v12 = vadd.f32 %v736_v10, %v606_v4  ;;  %v807_v13 = vadd.f32 %v776_v11, %v614_v5  ;;  %830 = sbr.rel (%p1562_p9) target bundleno = 1018 (0x3fa), region = 84  ;;  %1881 = vmatprep.subr.bf16.mxu0 (!%p1562_p9), %v1880_v50  ;;  %1907 = vmatpush3.bf16.msra.mxu1 (!%p1562_p9), %v1904_v61  ;;  %v1912_v4 = vpack.c.bf16 (!%p1562_p9), %v1036_v1, %v1035_v0  ;;  %v1037_v6 = vld [vmem:[#allocation11 + $0x30] sm:$0xff] (!%p1562_p9)  ;;  %v1038_v7 = vld [vmem:[#allocation11 + $0x38] sm:$0xff] (!%p1562_p9)  ;;  %v840_v48 = vld [vmem:[#allocation2 + $0x48] sm:$0xff] (!%p1562_p9) }
 0x1ff   : > { %816 = vst [vmem:[#allocation2 + $0x28] sm:$0xff] %v800_v8  ;;  %824 = vst [vmem:[#allocation2 + $0x68] sm:$0xff] %v808_v9  ;;  %v831_v51 = vld [vmem:[#allocation2] sm:$0xff] (!%p1562_p9)  ;;  %1909 = vmatprep.subr.bf16.mxu1 (!%p1562_p9), %v1908_v62  ;;  %v1892_v5 = vpack.c.bf16 (!%p1562_p9), %v858_v3, %v857_v2  ;;  %v860_v9 = vld [vmem:[#allocation9 + $0x68] sm:$0xff] (!%p1562_p9)  ;;  %v1916_v10 = vpack.c.bf16 (!%p1562_p9), %v1038_v7, %v1037_v6 }
 0x200   : > { %815 = vst [vmem:[#allocation2 + $0x20] sm:$0xff] %v799_v12  ;;  %823 = vst [vmem:[#allocation2 + $0x60] sm:$0xff] %v807_v13  ;;  %v1715_v34 = vpop.f32.mrb[6].mxu0  ;;  %v1727_v35 = vpop.f32.mrb[6].mxu1  ;;  %1760 = vmatprep.mubr.f32.mxu0 (!%p1562_p9), %v831_v51  ;;  %v859_v8 = vld [vmem:[#allocation9 + $0x60] sm:$0xff] (!%p1562_p9)  ;;  %v1040_v13 = vld [vmem:[#allocation11 + $0x48] sm:$0xff] (!%p1562_p9) }
 0x201   : > { %v802_v36 = vadd.f32 %v1715_v34, %v609_v14  ;;  %v810_v37 = vadd.f32 %v1727_v35, %v617_v15  ;;  %v746_v38 = vpop.f32.mrb[7].mxu0  ;;  %v786_v39 = vpop.f32.mrb[7].mxu1  ;;  %1883 = vmatpush3.bf16.msra.mxu0 (!%p1562_p9), %v1880_v50  ;;  %v1896_v11 = vpack.c.bf16 (!%p1562_p9), %v860_v9, %v859_v8  ;;  %v1039_v12 = vld [vmem:[#allocation11 + $0x40] sm:$0xff] (!%p1562_p9)  ;;  %v861_v14 = vld [vmem:[#allocation9 + $0x70] sm:$0xff] (!%p1562_p9)  ;;  %v862_v15 = vld [vmem:[#allocation9 + $0x78] sm:$0xff] (!%p1562_p9) }
 0x202   : > { %v801_v40 = vadd.f32 %v746_v38, %v608_v16  ;;  %v809_v41 = vadd.f32 %v786_v39, %v616_v17  ;;  %1885 = vmatprep.subr.bf16.mxu0 (!%p1562_p9), %v1884_v54  ;;  %1911 = vmatpush3.bf16.msra.mxu1 (!%p1562_p9), %v1908_v62  ;;  %v1920_v16 = vpack.c.bf16 (!%p1562_p9), %v1040_v13, %v1039_v12  ;;  %v1041_v34 = vld [vmem:[#allocation11 + $0x50] sm:$0xff] (!%p1562_p9)  ;;  %v1042_v35 = vld [vmem:[#allocation11 + $0x58] sm:$0xff] (!%p1562_p9)  ;;  %v1044_v38 = vld [vmem:[#allocation11 + $0x68] sm:$0xff] (!%p1562_p9) }
 0x203   : > { %818 = vst [vmem:[#allocation2 + $0x38] sm:$0xff] %v802_v36  ;;  %826 = vst [vmem:[#allocation2 + $0x78] sm:$0xff] %v810_v37  ;;  %1913 = vmatprep.subr.bf16.mxu1 (!%p1562_p9), %v1912_v4  ;;  %v1900_v17 = vpack.c.bf16 (!%p1562_p9), %v862_v15, %v861_v14  ;;  %v1924_v36 = vpack.c.bf16 (!%p1562_p9), %v1042_v35, %v1041_v34  ;;  %v1043_v37 = vld [vmem:[#allocation11 + $0x60] sm:$0xff] (!%p1562_p9)  ;;  %v832_v39 = vld [vmem:[#allocation2 + $0x8] sm:$0xff] (!%p1562_p9) }
 0x204   : > { %817 = vst [vmem:[#allocation2 + $0x30] sm:$0xff] %v801_v40  ;;  %825 = vst [vmem:[#allocation2 + $0x70] sm:$0xff] %v809_v41  ;;  %v1928_v40 = vpack.c.bf16 (!%p1562_p9), %v1044_v38, %v1043_v37  ;;  %v833_v41 = vld [vmem:[#allocation2 + $0x10] sm:$0xff] (!%p1562_p9)  ;;  %v834_v42 = vld [vmem:[#allocation2 + $0x18] sm:$0xff] (!%p1562_p9) }
 0x205   : > { %1887 = vmatpush3.bf16.msra.mxu0 %v1884_v54  ;;  %v839_v47 = vld [vmem:[#allocation2 + $0x40] sm:$0xff]  ;;  %v841_v49 = vld [vmem:[#allocation2 + $0x50] sm:$0xff]  ;;  %v842_v50 = vld [vmem:[#allocation2 + $0x58] sm:$0xff] }
 0x206   : > { %1889 = vmatprep.subr.bf16.mxu0 %v1888_v63  ;;  %1915 = vmatpush3.bf16.msra.mxu1 %v1912_v4  ;;  %v836_v44 = vld [vmem:[#allocation2 + $0x28] sm:$0xff]  ;;  %v1046_v56 = vld [vmem:[#allocation11 + $0x78] sm:$0xff] }
 0x207   : > { %1917 = vmatprep.subr.bf16.mxu1 %v1916_v10  ;;  %v835_v43 = vld [vmem:[#allocation2 + $0x20] sm:$0xff]  ;;  %v844_v52 = vld [vmem:[#allocation2 + $0x68] sm:$0xff]  ;;  %v1932_v57 = vpack.c.bf16 %v1046_v56, %v1045_v55 }
 0x208   : > { %v843_v51 = vld [vmem:[#allocation2 + $0x60] sm:$0xff] }
 0x209   : > { %1891 = vmatpush3.bf16.msra.mxu0 %v1888_v63 }
 0x20a   : > { %1893 = vmatprep.subr.bf16.mxu0 %v1892_v5  ;;  %1919 = vmatpush3.bf16.msra.mxu1 %v1916_v10  ;;  %v838_v46 = vld [vmem:[#allocation2 + $0x38] sm:$0xff] }
 0x20b   : > { %1921 = vmatprep.subr.bf16.mxu1 %v1920_v16  ;;  %v837_v45 = vld [vmem:[#allocation2 + $0x30] sm:$0xff]  ;;  %v846_v54 = vld [vmem:[#allocation2 + $0x78] sm:$0xff] }
 0x20c   : > { %v845_v53 = vld [vmem:[#allocation2 + $0x70] sm:$0xff] }
 0x20d   : > { %1895 = vmatpush3.bf16.msra.mxu0 %v1892_v5 }
 0x20e   : > { %1897 = vmatprep.subr.bf16.mxu0 %v1896_v11  ;;  %1923 = vmatpush3.bf16.msra.mxu1 %v1920_v16 }
 0x20f   : > { %1925 = vmatprep.subr.bf16.mxu1 %v1924_v36 }
 0x211   : > { %1899 = vmatpush3.bf16.msra.mxu0 %v1896_v11 }
 0x212   : > { %1901 = vmatprep.subr.bf16.mxu0 %v1900_v17  ;;  %1927 = vmatpush3.bf16.msra.mxu1 %v1924_v36 }
 0x213   : > { %1929 = vmatprep.subr.bf16.mxu1 %v1928_v40 }
 0x215   : > { %1903 = vmatpush3.bf16.msra.mxu0 %v1900_v17 }
 0x216   : > { %1931 = vmatpush3.bf16.msra.mxu1 %v1928_v40 }
 0x217   : > { %1933 = vmatprep.subr.bf16.mxu1 %v1932_v57 }
 0x218   : > { %1761 = vmatmul.mubr.f32.vlgmr.msra.gmra.mrb[0].mxu0 %v832_v39 }
 0x219   : > { %1763 = vmatprep.mubr.f32.mxu0 %v833_v41 }
 0x21a   : > { %1935 = vmatpush3.bf16.msra.mxu1 %v1932_v57 }
 0x21c   : > { %1764 = vmatmul.mubr.f32.gmra.mrb[2].mxu0 %v834_v42 }
 0x21d   : > { %1766 = vmatprep.mubr.f32.mxu0 %v835_v43 }
 0x220   : > { %1767 = vmatmul.mubr.f32.gmra.mrb[4].mxu0 %v836_v44 }
 0x221   : > { %1769 = vmatprep.mubr.f32.mxu0 %v837_v45 }
 0x224   : > { %1770 = vmatmul.mubr.f32.gmra.mrb[6].mxu0 %v838_v46 }
 0x225   : > { %1772 = vmatprep.mubr.f32.mxu0 %v839_v47 }
 0x228   : > { %1773 = vmatmul.mubr.f32.gmra.mrb[8].mxu0 %v840_v48 }
 0x229   : > { %1775 = vmatprep.mubr.f32.mxu0 %v841_v49 }
 0x22c   : > { %1776 = vmatmul.mubr.f32.gmra.mrb[10].mxu0 %v842_v50 }
 0x22d   : > { %1778 = vmatprep.mubr.f32.mxu0 %v843_v51 }
 0x230   : > { %1779 = vmatmul.mubr.f32.gmra.mrb[12].mxu0 %v844_v52 }
 0x231   : > { %1781 = vmatprep.mubr.f32.mxu0 %v845_v53 }
 0x234   : > { %1782 = vmatmul.mubr.f32.gmra.mrb[14].mxu0 %v846_v54 }
 0x2eb   : > { %v1762_v59 = vpop.f32.mrb[0].mxu0 }
 0x2ec   : > { %v942_v60 = vadd.f32 %v1762_v59, %v1563_v58  ;;  %v936_v61 = vpop.f32.mrb[1].mxu0 }
 0x2ed   : > { %v937_v62 = vadd.f32 %v1563_v58, %v936_v61 }
 0x2ee   : > { %v1016_v1 = vmax.f32 %v942_v60, 0.0  ;;  %v3044_v60 = vld [vmem:[%s3314_s26] ss:$0 sm:$0xff] }
 0x2ef   : > { %v1765_v63 = vpop.f32.mrb[2].mxu0  ;;  %v1015_v0 = vmax.f32 %v937_v62, 0.0 }
 0x2f0   : > { %v952_v2 = vadd.f32 %v1765_v63, %v1563_v58  ;;  %v946_v3 = vpop.f32.mrb[3].mxu0 }
 0x2f1   : > { %v947_v4 = vadd.f32 %v1563_v58, %v946_v3  ;;  %1816 = vmatprep.mubr.f32.mxu1 %v1015_v0 }
 0x2f2   : > { %1817 = vmatmul.mubr.f32.vlgmr.msra.gmra.mrb[0].mxu1 %v1016_v1  ;;  %v1018_v7 = vmax.f32 %v952_v2, 0.0 }
 0x2f3   : > { %v1017_v5 = vmax.f32 %v947_v4, 0.0  ;;  %v1768_v6 = vpop.f32.mrb[4].mxu0 }
 0x2f4   : > { %v962_v8 = vadd.f32 %v1768_v6, %v1563_v58  ;;  %v956_v9 = vpop.f32.mrb[5].mxu0 }
 0x2f5   : > { %v957_v10 = vadd.f32 %v1563_v58, %v956_v9  ;;  %1819 = vmatprep.mubr.f32.mxu1 %v1017_v5 }
 0x2f6   : > { %1820 = vmatmul.mubr.f32.gmra.mrb[2].mxu1 %v1018_v7  ;;  %v1020_v13 = vmax.f32 %v962_v8, 0.0 }
 0x2f7   : > { %v1019_v11 = vmax.f32 %v957_v10, 0.0  ;;  %v1771_v12 = vpop.f32.mrb[6].mxu0 }
 0x2f8   : > { %v972_v14 = vadd.f32 %v1771_v12, %v1563_v58  ;;  %v966_v15 = vpop.f32.mrb[7].mxu0 }
 0x2f9   : > { %v967_v16 = vadd.f32 %v1563_v58, %v966_v15  ;;  %1822 = vmatprep.mubr.f32.mxu1 %v1019_v11 }
 0x2fa   : > { %1823 = vmatmul.mubr.f32.gmra.mrb[4].mxu1 %v1020_v13  ;;  %v1022_v35 = vmax.f32 %v972_v14, 0.0 }
 0x2fb   : > { %v1021_v17 = vmax.f32 %v967_v16, 0.0  ;;  %v1774_v34 = vpop.f32.mrb[8].mxu0 }
 0x2fc   : > { %v982_v36 = vadd.f32 %v1774_v34, %v1563_v58  ;;  %v976_v37 = vpop.f32.mrb[9].mxu0 }
 0x2fd   : > { %v977_v38 = vadd.f32 %v1563_v58, %v976_v37  ;;  %1825 = vmatprep.mubr.f32.mxu1 %v1021_v17 }
 0x2fe   : > { %1826 = vmatmul.mubr.f32.gmra.mrb[6].mxu1 %v1022_v35  ;;  %v1024_v41 = vmax.f32 %v982_v36, 0.0 }
 0x2ff   : > { %v1023_v39 = vmax.f32 %v977_v38, 0.0  ;;  %v1777_v40 = vpop.f32.mrb[10].mxu0 }
 0x300   : > { %v992_v42 = vadd.f32 %v1777_v40, %v1563_v58  ;;  %v986_v43 = vpop.f32.mrb[11].mxu0 }
 0x301   : > { %v987_v44 = vadd.f32 %v1563_v58, %v986_v43  ;;  %1828 = vmatprep.mubr.f32.mxu1 %v1023_v39 }
 0x302   : > { %1829 = vmatmul.mubr.f32.gmra.mrb[8].mxu1 %v1024_v41  ;;  %v1026_v47 = vmax.f32 %v992_v42, 0.0 }
 0x303   : > { %v1025_v45 = vmax.f32 %v987_v44, 0.0  ;;  %v1780_v46 = vpop.f32.mrb[12].mxu0 }
 0x304   : > { %v1002_v48 = vadd.f32 %v1780_v46, %v1563_v58  ;;  %v996_v49 = vpop.f32.mrb[13].mxu0 }
 0x305   : > { %v997_v50 = vadd.f32 %v1563_v58, %v996_v49  ;;  %1831 = vmatprep.mubr.f32.mxu1 %v1025_v45 }
 0x306   : > { %1832 = vmatmul.mubr.f32.gmra.mrb[10].mxu1 %v1026_v47  ;;  %v1028_v53 = vmax.f32 %v1002_v48, 0.0 }
 0x307   : > { %v1027_v51 = vmax.f32 %v997_v50, 0.0  ;;  %v1783_v52 = vpop.f32.mrb[14].mxu0 }
 0x308   : > { %v1012_v54 = vadd.f32 %v1783_v52, %v1563_v58  ;;  %v1006_v55 = vpop.f32.mrb[15].mxu0 }
 0x309   : > { %v1007_v56 = vadd.f32 %v1563_v58, %v1006_v55  ;;  %1834 = vmatprep.mubr.f32.mxu1 %v1027_v51 }
 0x30a   : > { %1835 = vmatmul.mubr.f32.gmra.mrb[12].mxu1 %v1028_v53  ;;  %v1030_v59 = vmax.f32 %v1012_v54, 0.0 }
 0x30b   : > { %v1029_v57 = vmax.f32 %v1007_v56, 0.0 }
 0x30d   : > { %1837 = vmatprep.mubr.f32.mxu1 %v1029_v57 }
 0x30e   : > { %1838 = vmatmul.mubr.f32.gmra.mrb[14].mxu1 %v1030_v59 }
 0x3c5   : > { %v1818_v61 = vpop.f32.mrb[0].mxu1 }
 0x3c6   : > { %v1126_v62 = vadd.f32 %v1818_v61, %v3044_v60  ;;  %v1120_v63 = vpop.f32.mrb[1].mxu1 }
 0x3c7   : > { %v1121_v0 = vadd.f32 %v3044_v60, %v1120_v63 }
 0x3c8   : > { %v1232_v58 = vsel %vm551_vm1, %v1126_v62, 0.0 }
 0x3c9   : > { %1248 = vst [vmem:[%s2982_s25 + $0x8] sm:$0xff] %v1232_v58  ;;  %v1285_v1 = vmul.f32 %v1232_v58, %v1232_v58  ;;  %v1231_v2 = vsel %vm550_vm0, %v1121_v0, 0.0  ;;  %v1821_v3 = vpop.f32.mrb[2].mxu1  ;;  %vm1321_vm0 = vcmask 1040384  }
 0x3ca   : > { %1247 = vst [vmem:[%s2982_s25] sm:$0xff] %v1231_v2  ;;  %v1263_v4 = vadd.f32 %v1232_v58, %v1231_v2  ;;  %v1284_v5 = vmul.f32 %v1231_v2, %v1231_v2  ;;  %v1136_v6 = vadd.f32 %v1821_v3, %v3044_v60  ;;  %v1130_v7 = vpop.f32.mrb[3].mxu1 }
 0x3cb   : > { %v1131_v8 = vadd.f32 %v3044_v60, %v1130_v7 }
 0x3cc   : > { %v1300_v9 = vadd.f32 %v1285_v1, %v1284_v5  ;;  %v1234_v19 = vsel %vm553_vm3, %v1136_v6, 0.0 }
 0x3cd   : > { %1250 = vst [vmem:[%s2982_s25 + $0x18] sm:$0xff] %v1234_v19  ;;  %v1233_v18 = vsel %vm552_vm2, %v1131_v8, 0.0  ;;  %v1824_v10 = vpop.f32.mrb[4].mxu1  ;;  %v1287_v16 = vmul.f32 %v1234_v19, %v1234_v19 }
 0x3ce   : > { %1249 = vst [vmem:[%s2982_s25 + $0x10] sm:$0xff] %v1233_v18  ;;  %v1264_v11 = vadd.f32 %v1263_v4, %v1233_v18  ;;  %v1286_v12 = vmul.f32 %v1233_v18, %v1233_v18  ;;  %v1146_v13 = vadd.f32 %v1824_v10, %v3044_v60  ;;  %v1140_v14 = vpop.f32.mrb[5].mxu1 }
 0x3cf   : > { %v1141_v15 = vadd.f32 %v3044_v60, %v1140_v14 }
 0x3d0   : > { %v1301_v17 = vadd.f32 %v1300_v9, %v1286_v12  ;;  %v1236_v21 = vsel %vm555_vm5, %v1146_v13, 0.0  ;;  %v1265_v34 = vadd.f32 %v1264_v11, %v1234_v19 }
 0x3d1   : > { %1252 = vst [vmem:[%s2982_s25 + $0x28] sm:$0xff] %v1236_v21  ;;  %v1235_v20 = vsel %vm554_vm4, %v1141_v15, 0.0  ;;  %v1827_v35 = vpop.f32.mrb[6].mxu1  ;;  %v1289_v42 = vmul.f32 %v1236_v21, %v1236_v21 }
 0x3d2   : > { %1251 = vst [vmem:[%s2982_s25 + $0x20] sm:$0xff] %v1235_v20  ;;  %v1266_v36 = vadd.f32 %v1265_v34, %v1235_v20  ;;  %v1288_v37 = vmul.f32 %v1235_v20, %v1235_v20  ;;  %v1302_v38 = vadd.f32 %v1301_v17, %v1287_v16  ;;  %v1156_v39 = vadd.f32 %v1827_v35, %v3044_v60  ;;  %v1150_v40 = vpop.f32.mrb[7].mxu1 }
 0x3d3   : > { %v1151_v41 = vadd.f32 %v3044_v60, %v1150_v40 }
 0x3d4   : > { %v1303_v23 = vadd.f32 %v1302_v38, %v1288_v37  ;;  %v1238_v43 = vsel %vm557_vm7, %v1156_v39, 0.0  ;;  %v1267_v44 = vadd.f32 %v1266_v36, %v1236_v21 }
 0x3d5   : > { %1254 = vst [vmem:[%s2982_s25 + $0x38] sm:$0xff] %v1238_v43  ;;  %v1237_v22 = vsel %vm556_vm6, %v1151_v41, 0.0  ;;  %v1830_v45 = vpop.f32.mrb[8].mxu1  ;;  %v1291_v52 = vmul.f32 %v1238_v43, %v1238_v43 }
 0x3d6   : > { %1253 = vst [vmem:[%s2982_s25 + $0x30] sm:$0xff] %v1237_v22  ;;  %v1268_v46 = vadd.f32 %v1267_v44, %v1237_v22  ;;  %v1290_v47 = vmul.f32 %v1237_v22, %v1237_v22  ;;  %v1304_v48 = vadd.f32 %v1303_v23, %v1289_v42  ;;  %v1166_v49 = vadd.f32 %v1830_v45, %v3044_v60  ;;  %v1160_v50 = vpop.f32.mrb[9].mxu1 }
 0x3d7   : > { %v1161_v51 = vadd.f32 %v3044_v60, %v1160_v50 }
 0x3d8   : > { %v1305_v25 = vadd.f32 %v1304_v48, %v1290_v47  ;;  %v1240_v53 = vsel %vm559_vm9, %v1166_v49, 0.0  ;;  %v1269_v54 = vadd.f32 %v1268_v46, %v1238_v43 }
 0x3d9   : > { %1256 = vst [vmem:[%s2982_s25 + $0x48] sm:$0xff] %v1240_v53  ;;  %v1239_v24 = vsel %vm558_vm8, %v1161_v51, 0.0  ;;  %v1833_v55 = vpop.f32.mrb[10].mxu1  ;;  %v1293_v0 = vmul.f32 %v1240_v53, %v1240_v53 }
 0x3da   : > { %1255 = vst [vmem:[%s2982_s25 + $0x40] sm:$0xff] %v1239_v24  ;;  %v1270_v56 = vadd.f32 %v1269_v54, %v1239_v24  ;;  %v1292_v57 = vmul.f32 %v1239_v24, %v1239_v24  ;;  %v1306_v59 = vadd.f32 %v1305_v25, %v1291_v52  ;;  %v1176_v61 = vadd.f32 %v1833_v55, %v3044_v60  ;;  %v1170_v62 = vpop.f32.mrb[11].mxu1 }
 0x3db   : > { %v1171_v63 = vadd.f32 %v3044_v60, %v1170_v62 }
 0x3dc   : > { %v1307_v27 = vadd.f32 %v1306_v59, %v1292_v57  ;;  %v1242_v58 = vsel %vm561_vm11, %v1176_v61, 0.0  ;;  %v1271_v1 = vadd.f32 %v1270_v56, %v1240_v53 }
 0x3dd   : > { %1258 = vst [vmem:[%s2982_s25 + $0x58] sm:$0xff] %v1242_v58  ;;  %v1241_v26 = vsel %vm560_vm10, %v1171_v63, 0.0  ;;  %v1836_v2 = vpop.f32.mrb[12].mxu1  ;;  %v1295_v9 = vmul.f32 %v1242_v58, %v1242_v58 }
 0x3de   : > { %1257 = vst [vmem:[%s2982_s25 + $0x50] sm:$0xff] %v1241_v26  ;;  %v1272_v3 = vadd.f32 %v1271_v1, %v1241_v26  ;;  %v1294_v4 = vmul.f32 %v1241_v26, %v1241_v26  ;;  %v1308_v5 = vadd.f32 %v1307_v27, %v1293_v0  ;;  %v1186_v6 = vadd.f32 %v1836_v2, %v3044_v60  ;;  %v1180_v7 = vpop.f32.mrb[13].mxu1 }
 0x3df   : > { %v1181_v8 = vadd.f32 %v3044_v60, %v1180_v7 }
 0x3e0   : > { %v1309_v29 = vadd.f32 %v1308_v5, %v1294_v4  ;;  %v1244_v19 = vsel %vm563_vm13, %v1186_v6, 0.0  ;;  %v1273_v18 = vadd.f32 %v1272_v3, %v1242_v58 }
 0x3e1   : > { %1260 = vst [vmem:[%s2982_s25 + $0x68] sm:$0xff] %v1244_v19  ;;  %v1243_v28 = vsel %vm562_vm12, %v1181_v8, 0.0  ;;  %v1839_v10 = vpop.f32.mrb[14].mxu1  ;;  %v1297_v17 = vmul.f32 %v1244_v19, %v1244_v19 }
 0x3e2   : > { %1259 = vst [vmem:[%s2982_s25 + $0x60] sm:$0xff] %v1243_v28  ;;  %v1274_v11 = vadd.f32 %v1273_v18, %v1243_v28  ;;  %v1296_v12 = vmul.f32 %v1243_v28, %v1243_v28  ;;  %v1310_v13 = vadd.f32 %v1309_v29, %v1295_v9  ;;  %v1196_v14 = vadd.f32 %v1839_v10, %v3044_v60  ;;  %v1190_v15 = vpop.f32.mrb[15].mxu1 }
 0x3e3   : > { %v1191_v16 = vadd.f32 %v3044_v60, %v1190_v15 }
 0x3e4   : > { %v1311_v31 = vadd.f32 %v1310_v13, %v1296_v12  ;;  %v1246_v21 = vsel %vm565_vm15, %v1196_v14, 0.0  ;;  %v1275_v34 = vadd.f32 %v1274_v11, %v1244_v19 }
 0x3e5   : > { %1262 = vst [vmem:[%s2982_s25 + $0x78] sm:$0xff] %v1246_v21  ;;  %v1245_v30 = vsel %vm564_vm14, %v1191_v16, 0.0  ;;  %v1299_v37 = vmul.f32 %v1246_v21, %v1246_v21 }
 0x3e6   : > { %1261 = vst [vmem:[%s2982_s25 + $0x70] sm:$0xff] %v1245_v30  ;;  %v1276_v20 = vadd.f32 %v1275_v34, %v1245_v30  ;;  %v1298_v35 = vmul.f32 %v1245_v30, %v1245_v30  ;;  %v1312_v36 = vadd.f32 %v1311_v31, %v1297_v17 }
 0x3e8   : > { %v1277_v38 = vadd.f32 %v1276_v20, %v1246_v21  ;;  %v1313_v39 = vadd.f32 %v1312_v36, %v1298_v35 }
 0x3ea   : > { %v1278_v40 = vrot.slane %v1277_v38, 4  ;;  %v1314_v60 = vadd.f32 %v1313_v39, %v1299_v37 }
 0x3ec   : > { %v1279_v41 = vadd.f32 %v1278_v40, %v1277_v38  ;;  %v1315_v42 = vrot.slane %v1314_v60, 4 }
 0x3ee   : > { %v1280_v23 = vrot.slane %v1279_v41, 2  ;;  %v1316_v33 = vadd.f32 %v1315_v42, %v1314_v60 }
 0x3f0   : > { %v1281_v43 = vadd.f32 %v1280_v23, %v1279_v41  ;;  %v1317_v44 = vrot.slane %v1316_v33, 2 }
 0x3f2   : > { %v1282_v22 = vrot.slane %v1281_v43, 1  ;;  %v1318_v45 = vadd.f32 %v1317_v44, %v1316_v33 }
 0x3f4   : > { %v1319_v32 = vrot.slane %v1318_v45, 1  ;;  %v1283_v46 = vadd.f32 %v1282_v22, %v1281_v43 }
 0x3f6   : > { %v1320_v47 = vadd.f32 %v1319_v32, %v1318_v45 }
 0x3f8   : > { %v1322_v48 = vsel %vm1321_vm0, %v1283_v46, %v1320_v47 }
 0x3f9   : > { %1323 = vst [vmem:[%s2986_s6] sm:$0x3] %v1322_v48 }
 0x3fa PF: > { %s3315_s9 = sld [smem:[#allocation24_spill]]  ;;  %s1343_s8 = sshll.u32 %s2982_s25, 4  ;;  %s3118_s8 = int_to_ptr.vmem [resolvable:$true] %s1343_s8 }
 0x3fb   : > { %s3316_s11 = sld [smem:[#allocation36_spill]]  ;;  %s1325_s17 = scalar_lea.sflag [#allocation5], %s2915_s30 }
 0x3fc   : > { %s2265_s1 = scalar_lea.vmem %s3118_s8, 2048  ;;  %p3317_p8 = scmp.ne.s32.totalorder %s3296_s16, 0 }
 0x3fd   : > { %p2266_p10 = scmp.ne.s32.totalorder %s3118_s8, %s2265_s1  ;;  %s2465_s5 = smov [#allocation12]  }
 0x3fe   : > { %s2269_s21 = sshll.u32 %s2465_s5, 4  ;;  %s2270_s21 = int_to_ptr.vmem [resolvable:$false] %s2269_s21 }
 0x3ff   : > { %p2267_p11 = pnand %p2266_p10, %p3317_p8  ;;  %s2271_s0 = scalar_lea.vmem %s2270_s21, 4096 }
 0x400   : > { %s1575_s15 = sshll.u32 %s3315_s9, 11  ;;  %p2272_p5 = scmp.lt.s32.totalorder %s3118_s8, %s2270_s21 }
 0x401   : > { %s3115_s20 = scalar_lea.hbm %s3316_s11, %s1575_s15  ;;  %p2268_p3 = pneg %p2267_p11 }
 0x402   : > { %p2273_p1 = scmp.lt.s32.totalorder %s2271_s0, %s2265_s1 }
 0x404   : > { %p2274_p4 = por %p2273_p1, %p2272_p5 }
 0x406   : > { %p2275_p2 = pnand %p2274_p4, %p2268_p3 }
 0x408   : > { %2278 = shalt.err (!%p2275_p2)
}
 0x409   : > { %s2279_s25 = scalar_lea.hbm %s3115_s20, 2048  ;;  %s2283_s15 = scalar_lea.hbm %s3316_s11, 4096 }
 0x40a   : > { %p2280_p6 = scmp.ne.s32.totalorder %s3115_s20, %s2279_s25  ;;  %p2284_p0 = scmp.lt.u32.totalorder %s3115_s20, %s3316_s11 }
 0x40b   : > { %p2285_p12 = scmp.lt.u32.totalorder %s2283_s15, %s2279_s25  ;;  %p2287_p10 = scmp.lt.u32.totalorder %s2279_s25, %s3115_s20 }
 0x40c   : > { %p2281_p7 = pnand %p2280_p6, %p3317_p8 }
 0x40d   : > { %p2286_p9 = por %p2285_p12, %p2284_p0 }
 0x40e   : > { %p2282_p13 = pneg %p2281_p7 }
 0x40f   : > { %p2288_p11 = por %p2287_p10, %p2286_p9 }
 0x411   : > { %p2289_p3 = pnand %p2288_p11, %p2282_p13 }
 0x413   : > { %2292 = shalt.err (!%p2289_p3)
}
 0x414   : > { %s2466_s1 = smov 128   ;;  %s2467_s5 = smov 8  }
 0x415   : > { %1966 = dma.vmem_to_hbm [thread:$0]  (%p3317_p8), %s3118_s8, 2048, %s3115_s20, %s1325_s17, %s2466_s1, %s2466_s1, %s2467_s5  }
 0x416   : > { %s1569_s21 = sshll.u32 %s3315_s9, 5  ;;  %s1359_s0 = sshll.u32 %s2986_s6, 4  ;;  %s1360_s0 = int_to_ptr.vmem [resolvable:$true] %s1359_s0 }
 0x417   : > { %s3318_s26 = sld [smem:[#allocation37_spill]]  ;;  %s1330_s27 = scalar_lea.sflag [#allocation14], %s2915_s30 }
 0x418   : > { %s2293_s3 = scalar_lea.vmem %s1360_s0, 32  ;;  %s2468_s2 = smov [#allocation13]  }
 0x419   : > { %p2294_p5 = scmp.ne.s32.totalorder %s1360_s0, %s2293_s3  ;;  %s2297_s7 = sshll.u32 %s2468_s2, 4  ;;  %s2298_s7 = int_to_ptr.vmem [resolvable:$false] %s2297_s7 }
 0x41a   : > { %s2299_s11 = scalar_lea.vmem %s2298_s7, 64  ;;  %p2300_p2 = scmp.lt.s32.totalorder %s1360_s0, %s2298_s7 }
 0x41b   : > { %p2295_p1 = pnand %p2294_p5, %p3317_p8  ;;  %p2301_p6 = scmp.lt.s32.totalorder %s2299_s11, %s2293_s3 }
 0x41d   : > { %s3149_s15 = scalar_lea.hbm %s3318_s26, %s1569_s21  ;;  %p2296_p4 = pneg %p2295_p1 }
 0x41e   : > { %p2302_p7 = por %p2301_p6, %p2300_p2 }
 0x420   : > { %p2303_p13 = pnand %p2302_p7, %p2296_p4 }
 0x422   : > { %2306 = shalt.err (!%p2303_p13)
}
 0x423   : > { %s2307_s30 = scalar_lea.hbm %s3149_s15, 32  ;;  %s2311_s2 = scalar_lea.hbm %s3318_s26, 64 }
 0x424   : > { %p2308_p0 = scmp.ne.s32.totalorder %s3149_s15, %s2307_s30  ;;  %p2312_p10 = scmp.lt.u32.totalorder %s3149_s15, %s3318_s26 }
 0x425   : > { %p2313_p11 = scmp.lt.u32.totalorder %s2311_s2, %s2307_s30  ;;  %p2315_p5 = scmp.lt.u32.totalorder %s2307_s30, %s3149_s15 }
 0x426   : > { %p2309_p12 = pnand %p2308_p0, %p3317_p8 }
 0x427   : > { %p2314_p3 = por %p2313_p11, %p2312_p10 }
 0x428   : > { %p2310_p9 = pneg %p2309_p12 }
 0x429   : > { %p2316_p1 = por %p2315_p5, %p2314_p3 }
 0x42b   : > { %p2317_p4 = pnand %p2316_p1, %p2310_p9 }
 0x42d   : > { %2320 = shalt.err (!%p2317_p4)
}
 0x42e   : > { %1967 = dma.vmem_to_hbm [thread:$0]  (%p3317_p8), %s1360_s0, 32, %s3149_s15, %s1330_s27  }
 0x42f PF: > { %p1999_p2 = scmp.ge.s32.totalorder %s2455_s24, 2  ;;  %s1371_s11 = sand.u32 1, %s2403_s4  }
 0x430   : > { %p3319_p6 = scmp.ne.s32.totalorder %s3299_s29, 0  ;;  %s1372_s8 = scalar_lea.sflag [#allocation5], %s1371_s11 }
 0x432   : > { %p1988_p7 = pnand %p1999_p2, %p3319_p6 }
 0x434   : > { %2394 = dma.done.wait (!%p1988_p7), %s1372_s8, 2048  }
 0x435   : > { %2396 = vsyncadd (!%p1988_p7), %s1372_s8, 4294965248  ;;  %s1381_s17 = scalar_lea.sflag [#allocation14], %s1371_s11 }
 0x436   : > { %2398 = dma.done.wait (!%p1988_p7), %s1381_s17, 32  }
 0x437   : > { %2400 = vsyncadd (!%p1988_p7), %s1381_s17, 4294967264  ;;  %s34_s24 = sadd.s32 1, %s2455_s24   ;;  %s3321_s1 = sld [smem:[#allocation21_spill]] }
 0x438   : > { %p3174_p13 = scmp.ge.s32.totalorder %s34_s24, 6   ;;  %s3322_s15 = sld [smem:[#allocation22_spill]] }
 0x439   : > { %s3323_s5 = sld [smem:[#allocation27_spill]]  ;;  %s3324_s29 = sld [smem:[#allocation25_spill]] }
 0x43a   : > { %s3325_s0 = sld [smem:[#allocation26_spill]]  ;;  %s3327_s4 = smov %s2407_s12 }
 0x43b   : > { %s3328_s12 = smov %s2411_s13  ;;  %s3329_s13 = smov %s2825_s14 }
 0x43c   : > { %s3332_s17 = smov %s2431_s18  ;;  %s3333_s18 = smov %s2435_s19 }
 0x43d   : > { %s3330_s14 = smov %s3321_s1  ;;  %s3334_s19 = smov %s2758_s28 }
 0x43e   : > { %s3335_s20 = smov %s2447_s22  ;;  %s3336_s21 = smov %s2451_s23 }
 0x43f   : > { %s3331_s16 = smov %s3323_s5  ;;  %s3337_s22 = smov %s3324_s29 }
 0x440   : > { %s3338_s23 = smov %s3325_s0  ;;  %33 = sbr.rel (!%p3174_p13) target bundleno = 25 (0x19), region = 158 }
 0x447   :  { %1386 = vsyncpa [#allocation4], 1 }
 0x448   :  { %1388 = vsyncpa [#allocation4 + $0x1], 1 }
 0x449   :  { %1389 = vsyncpa [#allocation7], 1 }
 0x44a   :  { %1391 = vsyncpa [#allocation7 + $0x1], 1 }
 0x44b   :  { %1392 = vsyncpa [#allocation10], 1 }
 0x44c   :  { %1393 = vsyncpa [#allocation5], 1 }
 0x44d   :  { %1395 = vsyncpa [#allocation5 + $0x1], 1 }
 0x44e   :  { %1396 = vsyncpa [#allocation14], 1 }
 0x44f   :  { %1398 = vsyncpa [#allocation14 + $0x1], 1 }

</bundles_post_ra>
